<compile_context>
chip_gen: v5e
topology: v5e:2x2
jax: 0.10.0
libtpu: 0.0.40
codegen_flags: <defaults>
</compile_context>

<pallas_src>
import functools

import jax
import jax.numpy as jnp
from jax.experimental import pallas as pl
from jax.experimental.pallas import tpu as pltpu


def _round_up(n, m):
    return ((n + m - 1) // m) * m


def rnn_fc_kernel(x_ref, wih1_ref, b1_ref, whh1_ref, w2_ref, b2_ref,
                  wfc_ref, bfc_ref, out_ref, *, seq_len, batch_pad):
    T = seq_len
    Bp = batch_pad
    Hp = whh1_ref.shape[0]

    # Layer-1 input contributions for ALL timesteps in one matmul:
    #   u1[t*Bp:(t+1)*Bp] = x_t @ W_ih1^T + (b_ih1 + b_hh1)
    u1 = (jnp.dot(x_ref[...], wih1_ref[...],
                  preferred_element_type=jnp.float32)
          + b1_ref[...])                                      # (T*Bp, Hp)

    # Hoist the layer-2 bias broadcast out of the unrolled loop.
    b2 = jnp.broadcast_to(b2_ref[...], (Bp, Hp))              # (Bp, Hp)

    h1 = jnp.zeros((Bp, Hp), jnp.float32)
    h2 = jnp.zeros((Bp, Hp), jnp.float32)
    outs = []
    for t in range(T):  # static unroll: T is small and known at trace time
        u1_t = u1[t * Bp:(t + 1) * Bp]                        # (Bp, Hp)
        h1 = jnp.tanh(u1_t + jnp.dot(h1, whh1_ref[...],
                                     preferred_element_type=jnp.float32))
        # layer 2, fused: [h1, h2] @ [[W_ih2^T],[W_hh2^T]] + b2
        z2 = jnp.concatenate([h1, h2], axis=-1)               # (Bp, 2*Hp)
        h2 = jnp.tanh(jnp.dot(z2, w2_ref[...],
                              preferred_element_type=jnp.float32) + b2)
        outs.append(h2)

    # Single fused FC over the whole history: (Bp, T*Hp) @ (T*Hp, Cp).
    hist = jnp.concatenate(outs, axis=-1)                     # (Bp, T*Hp)
    out_ref[...] = (jnp.dot(hist, wfc_ref[...],
                            preferred_element_type=jnp.float32)
                    + bfc_ref[...])


def prepare_params(params, seq_len):
    """One-time weight prep: transpose, stack, zero-pad to lane-aligned shapes."""
    f32 = jnp.float32
    H = params["w_hh1"].shape[0]
    I = params["w_ih1"].shape[1]
    C = params["b_fc"].shape[0]
    T = seq_len
    Ip = _round_up(I, 128)
    Hp = _round_up(H, 128)
    Cp = _round_up(C, 128)

    wih1 = jnp.zeros((Ip, Hp), f32).at[:I, :H].set(params["w_ih1"].T)
    whh1 = jnp.zeros((Hp, Hp), f32).at[:H, :H].set(params["w_hh1"].T)
    b1 = jnp.zeros((1, Hp), f32).at[0, :H].set(params["b_ih1"] + params["b_hh1"])

    # Stacked layer-2 weight: rows [0:H] take h1, rows [Hp:Hp+H] take h2.
    w2 = jnp.zeros((2 * Hp, Hp), f32)
    w2 = w2.at[:H, :H].set(params["w_ih2"].T)
    w2 = w2.at[Hp:Hp + H, :H].set(params["w_hh2"].T)
    b2 = jnp.zeros((1, Hp), f32).at[0, :H].set(params["b_ih2"] + params["b_hh2"])

    # torch fc weight is (C, T*H) over flatten index t*H + h -> (T*Hp, Cp).
    wfc_t = params["w_fc"].T.reshape(T, H, C)                 # [t, h, c]
    wfc = (jnp.zeros((T, Hp, Cp), f32).at[:, :H, :C].set(wfc_t)
           .reshape(T * Hp, Cp))
    bfc = jnp.zeros((1, Cp), f32).at[0, :C].set(params["b_fc"])

    return {"wih1": wih1, "whh1": whh1, "b1": b1,
            "w2": w2, "b2": b2, "wfc": wfc, "bfc": bfc}


def rnn_forward(x, kparams):
    """x: (B, T, I) float32. Returns logits (B, num_classes)."""
    B, T, I = x.shape
    Ip = kparams["wih1"].shape[0]
    Hp = kparams["wih1"].shape[1]
    Cp = kparams["bfc"].shape[1]
    C = 10  # real class count is recovered by the caller's slice below
    Bp = max(_round_up(B, 8), 8)

    # time-major, batch/lane padded, flattened to (T*Bp, Ip) for one big matmul
    x_tm = jnp.transpose(x, (1, 0, 2))                        # (T, B, I)
    x_pad = jnp.zeros((T, Bp, Ip), jnp.float32).at[:, :B, :I].set(x_tm)
    x_flat = x_pad.reshape(T * Bp, Ip)

    kernel = functools.partial(rnn_fc_kernel, seq_len=T, batch_pad=Bp)
    vmem = pl.BlockSpec(memory_space=pltpu.MemorySpace.VMEM)

    out_pad = pl.pallas_call(
        kernel,
        out_shape=jax.ShapeDtypeStruct((Bp, Cp), jnp.float32),
        in_specs=[vmem] * 8,
        out_specs=vmem,
    )(x_flat, kparams["wih1"], kparams["b1"], kparams["whh1"],
      kparams["w2"], kparams["b2"], kparams["wfc"], kparams["bfc"])

    return out_pad[:B, :C]


def rnn_reference(x, params):
    """Pure-JAX reference matching torch nn.RNN(batch_first=True) + Linear."""
    B, T, I = x.shape
    H = params["w_hh1"].shape[0]
    h1 = jnp.zeros((B, H), jnp.float32)
    h2 = jnp.zeros((B, H), jnp.float32)
    outs = []
    for t in range(T):
        h1 = jnp.tanh(x[:, t] @ params["w_ih1"].T + params["b_ih1"]
                      + h1 @ params["w_hh1"].T + params["b_hh1"])
        h2 = jnp.tanh(h1 @ params["w_ih2"].T + params["b_ih2"]
                      + h2 @ params["w_hh2"].T + params["b_hh2"])
        outs.append(h2)
    out = jnp.stack(outs, axis=1).reshape(B, -1)
    return out @ params["w_fc"].T + params["b_fc"]


def init_params(key, input_size, hidden_size, seq_len, num_classes):
    """Deterministic init matching torch default shapes (U(-1/sqrt(H), 1/sqrt(H)))."""
    ks = jax.random.split(key, 10)
    k = 1.0 / jnp.sqrt(hidden_size)
    u = lambda kk, shape: jax.random.uniform(kk, shape, jnp.float32, -k, k)
    kf = 1.0 / jnp.sqrt(hidden_size * seq_len)
    return {
        # layer 0
        "w_ih1": u(ks[0], (hidden_size, input_size)),
        "w_hh1": u(ks[1], (hidden_size, hidden_size)),
        "b_ih1": u(ks[2], (hidden_size,)),
        "b_hh1": u(ks[3], (hidden_size,)),
        # layer 1
        "w_ih2": u(ks[4], (hidden_size, hidden_size)),
        "w_hh2": u(ks[5], (hidden_size, hidden_size)),
        "b_ih2": u(ks[6], (hidden_size,)),
        "b_hh2": u(ks[7], (hidden_size,)),
        # fc over flattened (seq_len * hidden_size)
        "w_fc": jax.random.uniform(ks[8], (num_classes, hidden_size * seq_len),
                                   jnp.float32, -kf, kf),
        "b_fc": jax.random.uniform(ks[9], (num_classes,), jnp.float32, -kf, kf),
    }


if __name__ == "__main__":
    # small shapes consistent with the module (B, T, I), 2-layer tanh RNN + FC
    B, T, I, H, C = 2, 8, 16, 32, 10

    key = jax.random.PRNGKey(0)
    kx, kp = jax.random.split(key)
    x = jax.random.normal(kx, (B, T, I), jnp.float32)
    params = init_params(kp, I, H, T, C)

    # one-time weight preparation (outside the per-call hot path)
    kparams = prepare_params(params, T)

    out = jax.block_until_ready(rnn_forward(x, kparams))
    ref = jax.block_until_ready(rnn_reference(x, params))

    assert out.shape == (B, C)
    assert jnp.allclose(out, ref, atol=1e-5, rtol=1e-5), (
        f"max abs err {jnp.max(jnp.abs(out - ref))}")
    print("KERNEL_OK")
</pallas_src>

<mosaic_0001>
module attributes {stable_mosaic.version = 11 : i64} {
  func.func @rnn_fc_kernel(%arg0: memref<64x128xf32, #tpu.memory_space<vmem>>, %arg1: memref<128x128xf32, #tpu.memory_space<vmem>>, %arg2: memref<1x128xf32, #tpu.memory_space<vmem>>, %arg3: memref<128x128xf32, #tpu.memory_space<vmem>>, %arg4: memref<256x128xf32, #tpu.memory_space<vmem>>, %arg5: memref<1x128xf32, #tpu.memory_space<vmem>>, %arg6: memref<1024x128xf32, #tpu.memory_space<vmem>>, %arg7: memref<1x128xf32, #tpu.memory_space<vmem>>, %arg8: memref<8x128xf32, #tpu.memory_space<vmem>>) attributes {dimension_semantics = [], scalar_prefetch = 0 : i64, scratch_operands = 0 : i64, tpu.core_type = #tpu.core_type<tc>} {
    %c0 = arith.constant 0 : index
    %c0_0 = arith.constant 0 : index
    %0 = vector.load %arg0[%c0, %c0_0] : memref<64x128xf32, #tpu.memory_space<vmem>>, vector<64x128xf32>
    %c0_1 = arith.constant 0 : index
    %c0_2 = arith.constant 0 : index
    %1 = vector.load %arg1[%c0_1, %c0_2] : memref<128x128xf32, #tpu.memory_space<vmem>>, vector<128x128xf32>
    %cst = arith.constant dense<0.000000e+00> : vector<64x128xf32>
    %2 = tpu.matmul %0, %1, %cst {dimension_numbers = #tpu.dot_dimension_numbers<[1], [0], [0], [1], [0, 0, 1, 1], [], []>} : vector<64x128xf32>, vector<128x128xf32>, vector<64x128xf32> -> vector<64x128xf32>
    %c0_3 = arith.constant 0 : index
    %c0_4 = arith.constant 0 : index
    %3 = vector.load %arg2[%c0_3, %c0_4] : memref<1x128xf32, #tpu.memory_space<vmem>>, vector<1x128xf32>
    %4 = vector.broadcast %3 : vector<1x128xf32> to vector<64x128xf32>
    %5 = arith.addf %2, %4 : vector<64x128xf32>
    %c0_5 = arith.constant 0 : index
    %c0_6 = arith.constant 0 : index
    %6 = vector.load %arg5[%c0_5, %c0_6] : memref<1x128xf32, #tpu.memory_space<vmem>>, vector<1x128xf32>
    %7 = vector.shape_cast %6 : vector<1x128xf32> to vector<1x128xf32>
    %8 = vector.broadcast %7 : vector<1x128xf32> to vector<8x128xf32>
    %cst_7 = arith.constant 0.000000e+00 : f32
    %9 = vector.broadcast %cst_7 : f32 to vector<8x128xf32>
    %cst_8 = arith.constant 0.000000e+00 : f32
    %10 = vector.broadcast %cst_8 : f32 to vector<8x128xf32>
    %11 = vector.extract_strided_slice %5 {offsets = [0, 0], sizes = [8, 128], strides = [1, 1]} : vector<64x128xf32> to vector<8x128xf32>
    %c0_9 = arith.constant 0 : index
    %c0_10 = arith.constant 0 : index
    %12 = vector.load %arg3[%c0_9, %c0_10] : memref<128x128xf32, #tpu.memory_space<vmem>>, vector<128x128xf32>
    %cst_11 = arith.constant dense<0.000000e+00> : vector<8x128xf32>
    %13 = tpu.matmul %9, %12, %cst_11 {dimension_numbers = #tpu.dot_dimension_numbers<[1], [0], [0], [1], [0, 0, 1, 1], [], []>} : vector<8x128xf32>, vector<128x128xf32>, vector<8x128xf32> -> vector<8x128xf32>
    %14 = arith.addf %11, %13 : vector<8x128xf32>
    %15 = math.tanh %14 : vector<8x128xf32>
    %16 = tpu.concatenate %15, %10 in 1 : vector<8x128xf32>, vector<8x128xf32> -> vector<8x256xf32>
    %c0_12 = arith.constant 0 : index
    %c0_13 = arith.constant 0 : index
    %17 = vector.load %arg4[%c0_12, %c0_13] : memref<256x128xf32, #tpu.memory_space<vmem>>, vector<256x128xf32>
    %cst_14 = arith.constant dense<0.000000e+00> : vector<8x128xf32>
    %18 = tpu.matmul %16, %17, %cst_14 {dimension_numbers = #tpu.dot_dimension_numbers<[1], [0], [0], [1], [0, 0, 1, 1], [], []>} : vector<8x256xf32>, vector<256x128xf32>, vector<8x128xf32> -> vector<8x128xf32>
    %19 = arith.addf %18, %8 : vector<8x128xf32>
    %20 = math.tanh %19 : vector<8x128xf32>
    %21 = vector.extract_strided_slice %5 {offsets = [8, 0], sizes = [8, 128], strides = [1, 1]} : vector<64x128xf32> to vector<8x128xf32>
    %c0_15 = arith.constant 0 : index
    %c0_16 = arith.constant 0 : index
    %22 = vector.load %arg3[%c0_15, %c0_16] : memref<128x128xf32, #tpu.memory_space<vmem>>, vector<128x128xf32>
    %cst_17 = arith.constant dense<0.000000e+00> : vector<8x128xf32>
    %23 = tpu.matmul %15, %22, %cst_17 {dimension_numbers = #tpu.dot_dimension_numbers<[1], [0], [0], [1], [0, 0, 1, 1], [], []>} : vector<8x128xf32>, vector<128x128xf32>, vector<8x128xf32> -> vector<8x128xf32>
    %24 = arith.addf %21, %23 : vector<8x128xf32>
    %25 = math.tanh %24 : vector<8x128xf32>
    %26 = tpu.concatenate %25, %20 in 1 : vector<8x128xf32>, vector<8x128xf32> -> vector<8x256xf32>
    %c0_18 = arith.constant 0 : index
    %c0_19 = arith.constant 0 : index
    %27 = vector.load %arg4[%c0_18, %c0_19] : memref<256x128xf32, #tpu.memory_space<vmem>>, vector<256x128xf32>
    %cst_20 = arith.constant dense<0.000000e+00> : vector<8x128xf32>
    %28 = tpu.matmul %26, %27, %cst_20 {dimension_numbers = #tpu.dot_dimension_numbers<[1], [0], [0], [1], [0, 0, 1, 1], [], []>} : vector<8x256xf32>, vector<256x128xf32>, vector<8x128xf32> -> vector<8x128xf32>
    %29 = arith.addf %28, %8 : vector<8x128xf32>
    %30 = math.tanh %29 : vector<8x128xf32>
    %31 = vector.extract_strided_slice %5 {offsets = [16, 0], sizes = [8, 128], strides = [1, 1]} : vector<64x128xf32> to vector<8x128xf32>
    %c0_21 = arith.constant 0 : index
    %c0_22 = arith.constant 0 : index
    %32 = vector.load %arg3[%c0_21, %c0_22] : memref<128x128xf32, #tpu.memory_space<vmem>>, vector<128x128xf32>
    %cst_23 = arith.constant dense<0.000000e+00> : vector<8x128xf32>
    %33 = tpu.matmul %25, %32, %cst_23 {dimension_numbers = #tpu.dot_dimension_numbers<[1], [0], [0], [1], [0, 0, 1, 1], [], []>} : vector<8x128xf32>, vector<128x128xf32>, vector<8x128xf32> -> vector<8x128xf32>
    %34 = arith.addf %31, %33 : vector<8x128xf32>
    %35 = math.tanh %34 : vector<8x128xf32>
    %36 = tpu.concatenate %35, %30 in 1 : vector<8x128xf32>, vector<8x128xf32> -> vector<8x256xf32>
    %c0_24 = arith.constant 0 : index
    %c0_25 = arith.constant 0 : index
    %37 = vector.load %arg4[%c0_24, %c0_25] : memref<256x128xf32, #tpu.memory_space<vmem>>, vector<256x128xf32>
    %cst_26 = arith.constant dense<0.000000e+00> : vector<8x128xf32>
    %38 = tpu.matmul %36, %37, %cst_26 {dimension_numbers = #tpu.dot_dimension_numbers<[1], [0], [0], [1], [0, 0, 1, 1], [], []>} : vector<8x256xf32>, vector<256x128xf32>, vector<8x128xf32> -> vector<8x128xf32>
    %39 = arith.addf %38, %8 : vector<8x128xf32>
    %40 = math.tanh %39 : vector<8x128xf32>
    %41 = vector.extract_strided_slice %5 {offsets = [24, 0], sizes = [8, 128], strides = [1, 1]} : vector<64x128xf32> to vector<8x128xf32>
    %c0_27 = arith.constant 0 : index
    %c0_28 = arith.constant 0 : index
    %42 = vector.load %arg3[%c0_27, %c0_28] : memref<128x128xf32, #tpu.memory_space<vmem>>, vector<128x128xf32>
    %cst_29 = arith.constant dense<0.000000e+00> : vector<8x128xf32>
    %43 = tpu.matmul %35, %42, %cst_29 {dimension_numbers = #tpu.dot_dimension_numbers<[1], [0], [0], [1], [0, 0, 1, 1], [], []>} : vector<8x128xf32>, vector<128x128xf32>, vector<8x128xf32> -> vector<8x128xf32>
    %44 = arith.addf %41, %43 : vector<8x128xf32>
    %45 = math.tanh %44 : vector<8x128xf32>
    %46 = tpu.concatenate %45, %40 in 1 : vector<8x128xf32>, vector<8x128xf32> -> vector<8x256xf32>
    %c0_30 = arith.constant 0 : index
    %c0_31 = arith.constant 0 : index
    %47 = vector.load %arg4[%c0_30, %c0_31] : memref<256x128xf32, #tpu.memory_space<vmem>>, vector<256x128xf32>
    %cst_32 = arith.constant dense<0.000000e+00> : vector<8x128xf32>
    %48 = tpu.matmul %46, %47, %cst_32 {dimension_numbers = #tpu.dot_dimension_numbers<[1], [0], [0], [1], [0, 0, 1, 1], [], []>} : vector<8x256xf32>, vector<256x128xf32>, vector<8x128xf32> -> vector<8x128xf32>
    %49 = arith.addf %48, %8 : vector<8x128xf32>
    %50 = math.tanh %49 : vector<8x128xf32>
    %51 = vector.extract_strided_slice %5 {offsets = [32, 0], sizes = [8, 128], strides = [1, 1]} : vector<64x128xf32> to vector<8x128xf32>
    %c0_33 = arith.constant 0 : index
    %c0_34 = arith.constant 0 : index
    %52 = vector.load %arg3[%c0_33, %c0_34] : memref<128x128xf32, #tpu.memory_space<vmem>>, vector<128x128xf32>
    %cst_35 = arith.constant dense<0.000000e+00> : vector<8x128xf32>
    %53 = tpu.matmul %45, %52, %cst_35 {dimension_numbers = #tpu.dot_dimension_numbers<[1], [0], [0], [1], [0, 0, 1, 1], [], []>} : vector<8x128xf32>, vector<128x128xf32>, vector<8x128xf32> -> vector<8x128xf32>
    %54 = arith.addf %51, %53 : vector<8x128xf32>
    %55 = math.tanh %54 : vector<8x128xf32>
    %56 = tpu.concatenate %55, %50 in 1 : vector<8x128xf32>, vector<8x128xf32> -> vector<8x256xf32>
    %c0_36 = arith.constant 0 : index
    %c0_37 = arith.constant 0 : index
    %57 = vector.load %arg4[%c0_36, %c0_37] : memref<256x128xf32, #tpu.memory_space<vmem>>, vector<256x128xf32>
    %cst_38 = arith.constant dense<0.000000e+00> : vector<8x128xf32>
    %58 = tpu.matmul %56, %57, %cst_38 {dimension_numbers = #tpu.dot_dimension_numbers<[1], [0], [0], [1], [0, 0, 1, 1], [], []>} : vector<8x256xf32>, vector<256x128xf32>, vector<8x128xf32> -> vector<8x128xf32>
    %59 = arith.addf %58, %8 : vector<8x128xf32>
    %60 = math.tanh %59 : vector<8x128xf32>
    %61 = vector.extract_strided_slice %5 {offsets = [40, 0], sizes = [8, 128], strides = [1, 1]} : vector<64x128xf32> to vector<8x128xf32>
    %c0_39 = arith.constant 0 : index
    %c0_40 = arith.constant 0 : index
    %62 = vector.load %arg3[%c0_39, %c0_40] : memref<128x128xf32, #tpu.memory_space<vmem>>, vector<128x128xf32>
    %cst_41 = arith.constant dense<0.000000e+00> : vector<8x128xf32>
    %63 = tpu.matmul %55, %62, %cst_41 {dimension_numbers = #tpu.dot_dimension_numbers<[1], [0], [0], [1], [0, 0, 1, 1], [], []>} : vector<8x128xf32>, vector<128x128xf32>, vector<8x128xf32> -> vector<8x128xf32>
    %64 = arith.addf %61, %63 : vector<8x128xf32>
    %65 = math.tanh %64 : vector<8x128xf32>
    %66 = tpu.concatenate %65, %60 in 1 : vector<8x128xf32>, vector<8x128xf32> -> vector<8x256xf32>
    %c0_42 = arith.constant 0 : index
    %c0_43 = arith.constant 0 : index
    %67 = vector.load %arg4[%c0_42, %c0_43] : memref<256x128xf32, #tpu.memory_space<vmem>>, vector<256x128xf32>
    %cst_44 = arith.constant dense<0.000000e+00> : vector<8x128xf32>
    %68 = tpu.matmul %66, %67, %cst_44 {dimension_numbers = #tpu.dot_dimension_numbers<[1], [0], [0], [1], [0, 0, 1, 1], [], []>} : vector<8x256xf32>, vector<256x128xf32>, vector<8x128xf32> -> vector<8x128xf32>
    %69 = arith.addf %68, %8 : vector<8x128xf32>
    %70 = math.tanh %69 : vector<8x128xf32>
    %71 = vector.extract_strided_slice %5 {offsets = [48, 0], sizes = [8, 128], strides = [1, 1]} : vector<64x128xf32> to vector<8x128xf32>
    %c0_45 = arith.constant 0 : index
    %c0_46 = arith.constant 0 : index
    %72 = vector.load %arg3[%c0_45, %c0_46] : memref<128x128xf32, #tpu.memory_space<vmem>>, vector<128x128xf32>
    %cst_47 = arith.constant dense<0.000000e+00> : vector<8x128xf32>
    %73 = tpu.matmul %65, %72, %cst_47 {dimension_numbers = #tpu.dot_dimension_numbers<[1], [0], [0], [1], [0, 0, 1, 1], [], []>} : vector<8x128xf32>, vector<128x128xf32>, vector<8x128xf32> -> vector<8x128xf32>
    %74 = arith.addf %71, %73 : vector<8x128xf32>
    %75 = math.tanh %74 : vector<8x128xf32>
    %76 = tpu.concatenate %75, %70 in 1 : vector<8x128xf32>, vector<8x128xf32> -> vector<8x256xf32>
    %c0_48 = arith.constant 0 : index
    %c0_49 = arith.constant 0 : index
    %77 = vector.load %arg4[%c0_48, %c0_49] : memref<256x128xf32, #tpu.memory_space<vmem>>, vector<256x128xf32>
    %cst_50 = arith.constant dense<0.000000e+00> : vector<8x128xf32>
    %78 = tpu.matmul %76, %77, %cst_50 {dimension_numbers = #tpu.dot_dimension_numbers<[1], [0], [0], [1], [0, 0, 1, 1], [], []>} : vector<8x256xf32>, vector<256x128xf32>, vector<8x128xf32> -> vector<8x128xf32>
    %79 = arith.addf %78, %8 : vector<8x128xf32>
    %80 = math.tanh %79 : vector<8x128xf32>
    %81 = vector.extract_strided_slice %5 {offsets = [56, 0], sizes = [8, 128], strides = [1, 1]} : vector<64x128xf32> to vector<8x128xf32>
    %c0_51 = arith.constant 0 : index
    %c0_52 = arith.constant 0 : index
    %82 = vector.load %arg3[%c0_51, %c0_52] : memref<128x128xf32, #tpu.memory_space<vmem>>, vector<128x128xf32>
    %cst_53 = arith.constant dense<0.000000e+00> : vector<8x128xf32>
    %83 = tpu.matmul %75, %82, %cst_53 {dimension_numbers = #tpu.dot_dimension_numbers<[1], [0], [0], [1], [0, 0, 1, 1], [], []>} : vector<8x128xf32>, vector<128x128xf32>, vector<8x128xf32> -> vector<8x128xf32>
    %84 = arith.addf %81, %83 : vector<8x128xf32>
    %85 = math.tanh %84 : vector<8x128xf32>
    %86 = tpu.concatenate %85, %80 in 1 : vector<8x128xf32>, vector<8x128xf32> -> vector<8x256xf32>
    %c0_54 = arith.constant 0 : index
    %c0_55 = arith.constant 0 : index
    %87 = vector.load %arg4[%c0_54, %c0_55] : memref<256x128xf32, #tpu.memory_space<vmem>>, vector<256x128xf32>
    %cst_56 = arith.constant dense<0.000000e+00> : vector<8x128xf32>
    %88 = tpu.matmul %86, %87, %cst_56 {dimension_numbers = #tpu.dot_dimension_numbers<[1], [0], [0], [1], [0, 0, 1, 1], [], []>} : vector<8x256xf32>, vector<256x128xf32>, vector<8x128xf32> -> vector<8x128xf32>
    %89 = arith.addf %88, %8 : vector<8x128xf32>
    %90 = math.tanh %89 : vector<8x128xf32>
    %91 = tpu.concatenate %20, %30, %40, %50, %60, %70, %80, %90 in 1 : vector<8x128xf32>, vector<8x128xf32>, vector<8x128xf32>, vector<8x128xf32>, vector<8x128xf32>, vector<8x128xf32>, vector<8x128xf32>, vector<8x128xf32> -> vector<8x1024xf32>
    %c0_57 = arith.constant 0 : index
    %c0_58 = arith.constant 0 : index
    %92 = vector.load %arg6[%c0_57, %c0_58] : memref<1024x128xf32, #tpu.memory_space<vmem>>, vector<1024x128xf32>
    %cst_59 = arith.constant dense<0.000000e+00> : vector<8x128xf32>
    %93 = tpu.matmul %91, %92, %cst_59 {dimension_numbers = #tpu.dot_dimension_numbers<[1], [0], [0], [1], [0, 0, 1, 1], [], []>} : vector<8x1024xf32>, vector<1024x128xf32>, vector<8x128xf32> -> vector<8x128xf32>
    %c0_60 = arith.constant 0 : index
    %c0_61 = arith.constant 0 : index
    %94 = vector.load %arg7[%c0_60, %c0_61] : memref<1x128xf32, #tpu.memory_space<vmem>>, vector<1x128xf32>
    %95 = vector.broadcast %94 : vector<1x128xf32> to vector<8x128xf32>
    %96 = arith.addf %93, %95 : vector<8x128xf32>
    %c0_62 = arith.constant 0 : index
    %c0_63 = arith.constant 0 : index
    %97 = vector.load %arg8[%c0_62, %c0_63] : memref<8x128xf32, #tpu.memory_space<vmem>>, vector<8x128xf32>
    tpu.vector_store %arg8[%c0_62, %c0_63], %96 {strides = array<i32>} : memref<8x128xf32, #tpu.memory_space<vmem>>, vector<8x128xf32>,
    return
  }
}

</mosaic_0001>

<bundles_post_ra>
// kernel: tpu_custom_call.1
= control target key start
LH: loop header
LB: loop body
LE: loop exit
PB: predicated region body
PF: predicated region fallthrough
CT: control target
= control target key end

     0   :  { %13 = vsyncpa [#allocation3], 0  ;;  %s1865_s0 = inlined_call_operand.hbm [shape: f32[64,128], index: 0, kind: input, shape index: {}]   ;;  %s1866_s1 = inlined_call_operand.hbm [shape: f32[128,128], index: 1, kind: input, shape index: {}]   ;;  %s1867_s2 = inlined_call_operand.vmem [shape: f32[1,128], index: 2, kind: input, shape index: {}]   ;;  %s1868_s3 = inlined_call_operand.hbm [shape: f32[128,128], index: 3, kind: input, shape index: {}]   ;;  %s1869_s4 = inlined_call_operand.hbm [shape: f32[256,128], index: 4, kind: input, shape index: {}]   ;;  %s1870_s5 = inlined_call_operand.vmem [shape: f32[1,128], index: 5, kind: input, shape index: {}]   ;;  %s1871_s6 = inlined_call_operand.hbm [shape: f32[1024,128], index: 6, kind: input, shape index: {}]   ;;  %s1872_s7 = inlined_call_operand.vmem [shape: f32[1,128], index: 7, kind: input, shape index: {}]   ;;  %s1873_s8 = inlined_call_operand.hbm [shape: f32[8,128], index: 8, kind: output, shape index: {}]  }
   0x1   :  { %14 = vsyncpa [#allocation6], 0 }
   0x2   :  { %15 = vsyncpa [#allocation9], 0 }
   0x3   :  { %16 = vsyncpa [#allocation4], 0  ;;  %s34_s29 = sshll.u32 %s1866_s1, 4  ;;  %s1243_s30 = smov [#allocation5]   ;;  %s35_s29 = int_to_ptr.hbm [resolvable:$true] %s34_s29 }
   0x4   :  { %s36_s9 = sshll.u32 %s1243_s30, 4  ;;  %s62_s12 = sshll.u32 %s1869_s4, 4  ;;  %s37_s9 = int_to_ptr.vmem [resolvable:$true] %s36_s9  ;;  %s63_s12 = int_to_ptr.hbm [resolvable:$true] %s62_s12 }
   0x5   :  { %s1244_s13 = smov 128   ;;  %s1245_s14 = smov 8  }
   0x6   :  { %42 = dma.hbm_to_vmem [thread:$0]  %s35_s29, 2048, %s37_s9, [#allocation6], %s1244_s13, %s1244_s13, %s1245_s14  }
   0x7   :  { %s1246_s15 = smov [#allocation8]   ;;  %s21_s19 = sshll.u32 %s1865_s0, 4  ;;  %s22_s19 = int_to_ptr.hbm [resolvable:$true] %s21_s19 }
   0x8   :  { %s64_s16 = sshll.u32 %s1246_s15, 4  ;;  %s49_s21 = sshll.u32 %s1868_s3, 4  ;;  %s65_s16 = int_to_ptr.vmem [resolvable:$true] %s64_s16  ;;  %s50_s21 = int_to_ptr.hbm [resolvable:$true] %s49_s21 }
   0x9   :  { %70 = dma.hbm_to_vmem [thread:$0]  %s63_s12, 4096, %s65_s16, [#allocation9], %s1244_s13, %s1244_s13, %s1245_s14  }
   0xa   :  { %s1247_s22 = smov [#allocation2]   ;;  %s1248_s4 = smov [#allocation7]  }
   0xb   :  { %s23_s23 = sshll.u32 %s1247_s22, 4  ;;  %s51_s24 = sshll.u32 %s1248_s4, 4  ;;  %s24_s23 = int_to_ptr.vmem [resolvable:$true] %s23_s23  ;;  %s52_s24 = int_to_ptr.vmem [resolvable:$true] %s51_s24 }
   0xc   :  { %29 = dma.hbm_to_vmem [thread:$0]  %s22_s19, 1024, %s24_s23, [#allocation3], %s1244_s13, %s1244_s13, %s1245_s14  }
   0xd   :  { %s77_s27 = sshll.u32 %s1871_s6, 4  ;;  %s1249_s0 = smov [#allocation10]   ;;  %s78_s27 = int_to_ptr.hbm [resolvable:$true] %s77_s27 }
   0xe   :  { %57 = dma.hbm_to_vmem [thread:$0]  %s50_s21, 2048, %s52_s24, [#allocation6], %s1244_s13, %s1244_s13, %s1245_s14  }
   0xf   :  { %s79_s28 = sshll.u32 %s1249_s0, 4  ;;  %s80_s28 = int_to_ptr.vmem [resolvable:$true] %s79_s28 }
  0x10   :  { %85 = dma.hbm_to_vmem [thread:$0]  %s78_s27, 16384, %s80_s28, [#allocation9], %s1244_s13, %s1244_s13, %s1245_s14  }
  0x11   :  { %1235 = dma.done.wait [#allocation3], 1024  }
  0x12   :  { %1236 = vsyncadd [#allocation3], 4294966272 }
  0x13   :  { %1237 = dma.done.wait [#allocation6], 4096  }
  0x14   :  { %1238 = vsyncadd [#allocation6], 4294963200 }
  0x15   :  { %1239 = dma.done.wait [#allocation9], 20480  }
  0x16   :  { %1240 = vsyncadd [#allocation9], 4294946816  ;;  %v131_v0 = vld [vmem:[#allocation5 + $0x78] sm:$0xff]  ;;  %v130_v1 = vld [vmem:[#allocation5 + $0x70] sm:$0xff]  ;;  %v1250_v52 = vmov 0.0   ;;  %s1033_s17 = sshll.u32 %s1873_s8, 4  ;;  %s1034_s17 = int_to_ptr.hbm [resolvable:$true] %s1033_s17 }
  0x17   :  { %v1312_v2 = vld [vmem:[#allocation7 + $0x78] sm:$0xff]  ;;  %136 = vmatpush.msra.mxu0 %v131_v0  ;;  %v1315_v3 = vld [vmem:[#allocation7 + $0x70] sm:$0xff]  ;;  %v129_v4 = vld [vmem:[#allocation5 + $0x68] sm:$0xff] }
  0x18   :  { %197 = vmatpush.msra.mxu1 %v1312_v2  ;;  %v1317_v5 = vld [vmem:[#allocation7 + $0x68] sm:$0xff]  ;;  %v128_v6 = vld [vmem:[#allocation5 + $0x60] sm:$0xff]  ;;  %v127_v8 = vld [vmem:[#allocation5 + $0x58] sm:$0xff] }
  0x19   :  { %137 = vmatpush.msra.mxu0 %v130_v1  ;;  %v1320_v7 = vld [vmem:[#allocation7 + $0x60] sm:$0xff]  ;;  %v1323_v9 = vld [vmem:[#allocation7 + $0x58] sm:$0xff]  ;;  %v126_v10 = vld [vmem:[#allocation5 + $0x50] sm:$0xff] }
  0x1a   :  { %198 = vmatpush.msra.mxu1 %v1315_v3  ;;  %v1326_v11 = vld [vmem:[#allocation7 + $0x50] sm:$0xff]  ;;  %v125_v12 = vld [vmem:[#allocation5 + $0x48] sm:$0xff]  ;;  %v1332_v14 = vld [vmem:[#allocation8 + $0x78] sm:$0xff] }
  0x1b   :  { %138 = vmatpush.msra.mxu0 %v129_v4  ;;  %v1329_v13 = vld [vmem:[#allocation7 + $0x48] sm:$0xff]  ;;  %v1334_v15 = vld [vmem:[#allocation8 + $0x70] sm:$0xff]  ;;  %v1336_v16 = vld [vmem:[#allocation8 + $0xf8] sm:$0xff]  ;;  %251 = vmatpush.msra.mxu2 %v1332_v14 }
  0x1c   :  { %199 = vmatpush.msra.mxu1 %v1317_v5  ;;  %v124_v17 = vld [vmem:[#allocation5 + $0x40] sm:$0xff]  ;;  %271 = vmatpush.msra.mxu3 %v1336_v16  ;;  %v1342_v19 = vld [vmem:[#allocation8 + $0xf0] sm:$0xff]  ;;  %v1345_v20 = vld [vmem:[#allocation8 + $0x68] sm:$0xff] }
  0x1d   :  { %139 = vmatpush.msra.mxu0 %v128_v6  ;;  %v1338_v18 = vld [vmem:[#allocation7 + $0x40] sm:$0xff]  ;;  %v1347_v21 = vld [vmem:[#allocation8 + $0xe8] sm:$0xff]  ;;  %v123_v22 = vld [vmem:[#allocation5 + $0x38] sm:$0xff]  ;;  %252 = vmatpush.msra.mxu2 %v1334_v15 }
  0x1e   :  { %200 = vmatpush.msra.mxu1 %v1320_v7  ;;  %v1349_v23 = vld [vmem:[#allocation7 + $0x38] sm:$0xff]  ;;  %272 = vmatpush.msra.mxu3 %v1342_v19  ;;  %v1354_v24 = vld [vmem:[#allocation8 + $0x60] sm:$0xff]  ;;  %v122_v26 = vld [vmem:[#allocation5 + $0x30] sm:$0xff] }
  0x1f   :  { %140 = vmatpush.msra.mxu0 %v127_v8  ;;  %v1356_v25 = vld [vmem:[#allocation8 + $0xe0] sm:$0xff]  ;;  %v1358_v27 = vld [vmem:[#allocation7 + $0x30] sm:$0xff]  ;;  %253 = vmatpush.msra.mxu2 %v1345_v20  ;;  %v1363_v28 = vld [vmem:[#allocation8 + $0x58] sm:$0xff] }
  0x20   :  { %201 = vmatpush.msra.mxu1 %v1323_v9  ;;  %273 = vmatpush.msra.mxu3 %v1347_v21  ;;  %v1365_v29 = vld [vmem:[#allocation8 + $0xd8] sm:$0xff]  ;;  %v121_v30 = vld [vmem:[#allocation5 + $0x28] sm:$0xff]  ;;  %v1372_v32 = vld [vmem:[#allocation8 + $0x50] sm:$0xff] }
  0x21   :  { %141 = vmatpush.msra.mxu0 %v126_v10  ;;  %v1367_v31 = vld [vmem:[#allocation7 + $0x28] sm:$0xff]  ;;  %254 = vmatpush.msra.mxu2 %v1354_v24  ;;  %v1374_v33 = vld [vmem:[#allocation8 + $0xd0] sm:$0xff]  ;;  %v120_v34 = vld [vmem:[#allocation5 + $0x20] sm:$0xff] }
  0x22   :  { %202 = vmatpush.msra.mxu1 %v1326_v11  ;;  %274 = vmatpush.msra.mxu3 %v1356_v25  ;;  %v1376_v35 = vld [vmem:[#allocation7 + $0x20] sm:$0xff]  ;;  %v1381_v36 = vld [vmem:[#allocation8 + $0x48] sm:$0xff]  ;;  %v119_v38 = vld [vmem:[#allocation5 + $0x18] sm:$0xff] }
  0x23   :  { %142 = vmatpush.msra.mxu0 %v125_v12  ;;  %255 = vmatpush.msra.mxu2 %v1363_v28  ;;  %v1383_v37 = vld [vmem:[#allocation8 + $0xc8] sm:$0xff]  ;;  %v1385_v39 = vld [vmem:[#allocation7 + $0x18] sm:$0xff]  ;;  %v1390_v40 = vld [vmem:[#allocation8 + $0x40] sm:$0xff] }
  0x24   :  { %203 = vmatpush.msra.mxu1 %v1329_v13  ;;  %275 = vmatpush.msra.mxu3 %v1365_v29  ;;  %v1392_v41 = vld [vmem:[#allocation8 + $0xc0] sm:$0xff]  ;;  %v118_v42 = vld [vmem:[#allocation5 + $0x10] sm:$0xff]  ;;  %v1399_v44 = vld [vmem:[#allocation8 + $0x38] sm:$0xff] }
  0x25   :  { %143 = vmatpush.msra.mxu0 %v124_v17  ;;  %256 = vmatpush.msra.mxu2 %v1372_v32  ;;  %v1394_v43 = vld [vmem:[#allocation7 + $0x10] sm:$0xff]  ;;  %v1401_v45 = vld [vmem:[#allocation8 + $0xb8] sm:$0xff]  ;;  %v117_v46 = vld [vmem:[#allocation5 + $0x8] sm:$0xff] }
  0x26   :  { %204 = vmatpush.msra.mxu1 %v1338_v18  ;;  %276 = vmatpush.msra.mxu3 %v1374_v33  ;;  %v1403_v47 = vld [vmem:[#allocation7 + $0x8] sm:$0xff]  ;;  %v1408_v48 = vld [vmem:[#allocation8 + $0x30] sm:$0xff]  ;;  %v116_v49 = vld [vmem:[#allocation5] sm:$0xff] }
  0x27   :  { %144 = vmatpush.msra.mxu0 %v123_v22  ;;  %257 = vmatpush.msra.mxu2 %v1381_v36  ;;  %v1410_v50 = vld [vmem:[#allocation7] sm:$0xff]  ;;  %v1470_v53 = vld [vmem:[#allocation8 + $0x28] sm:$0xff]  ;;  %v1472_v54 = vld [vmem:[#allocation8 + $0xb0] sm:$0xff] }
  0x28   :  { %205 = vmatpush.msra.mxu1 %v1349_v23  ;;  %277 = vmatpush.msra.mxu3 %v1383_v37  ;;  %v108_v51 = vld [vmem:[#allocation2] sm:$0xff]  ;;  %v1478_v56 = vld [vmem:[#allocation8 + $0xa8] sm:$0xff]  ;;  %v1484_v57 = vld [vmem:[#allocation8 + $0x18] sm:$0xff] }
  0x29   :  { %145 = vmatpush.msra.mxu0 %v122_v26  ;;  %258 = vmatpush.msra.mxu2 %v1390_v40  ;;  %v1476_v55 = vld [vmem:[#allocation8 + $0x20] sm:$0xff]  ;;  %v1492_v59 = vld [vmem:[#allocation8 + $0x10] sm:$0xff]  ;;  %v1494_v60 = vld [vmem:[#allocation8 + $0x98] sm:$0xff] }
  0x2a   :  { %206 = vmatpush.msra.mxu1 %v1358_v27  ;;  %278 = vmatpush.msra.mxu3 %v1392_v41  ;;  %v1486_v58 = vld [vmem:[#allocation8 + $0xa0] sm:$0xff]  ;;  %v1496_v61 = vld [vmem:[#allocation8 + $0x8] sm:$0xff]  ;;  %v1498_v62 = vld [vmem:[#allocation8 + $0x90] sm:$0xff] }
  0x2b   :  { %146 = vmatpush.msra.mxu0 %v121_v30  ;;  %259 = vmatpush.msra.mxu2 %v1399_v44  ;;  %v109_v63 = vld [vmem:[#allocation2 + $0x8] sm:$0xff]  ;;  %v1504_v0 = vld [vmem:[#allocation8] sm:$0xff]  ;;  %v110_v6 = vld [vmem:[#allocation2 + $0x10] sm:$0xff] }
  0x2c   :  { %207 = vmatpush.msra.mxu1 %v1367_v31  ;;  %279 = vmatpush.msra.mxu3 %v1401_v45  ;;  %v1506_v1 = vld [vmem:[#allocation8 + $0x88] sm:$0xff]  ;;  %v1515_v4 = vld [vmem:[#allocation8 + $0x80] sm:$0xff]  ;;  %v111_v8 = vld [vmem:[#allocation2 + $0x18] sm:$0xff] }
  0x2d   :  { %147 = vmatpush.msra.mxu0 %v120_v34  ;;  %260 = vmatpush.msra.mxu2 %v1408_v48  ;;  %v1541_v10 = vld [vmem:[%s1867_s2] ss:$0 sm:$0xff]  ;;  %v113_v34 = vld [vmem:[#allocation2 + $0x28] sm:$0xff] }
  0x2e   :  { %208 = vmatpush.msra.mxu1 %v1376_v35  ;;  %280 = vmatpush.msra.mxu3 %v1472_v54  ;;  %v112_v12 = vld [vmem:[#allocation2 + $0x20] sm:$0xff] }
  0x2f   :  { %148 = vmatpush.msra.mxu0 %v119_v38  ;;  %261 = vmatpush.msra.mxu2 %v1470_v53 }
  0x30   :  { %209 = vmatpush.msra.mxu1 %v1385_v39  ;;  %281 = vmatpush.msra.mxu3 %v1478_v56 }
  0x31   :  { %149 = vmatpush.msra.mxu0 %v118_v42  ;;  %262 = vmatpush.msra.mxu2 %v1476_v55  ;;  %v114_v42 = vld [vmem:[#allocation2 + $0x30] sm:$0xff] }
  0x32   :  { %210 = vmatpush.msra.mxu1 %v1394_v43  ;;  %282 = vmatpush.msra.mxu3 %v1486_v58 }
  0x33   :  { %150 = vmatpush.msra.mxu0 %v117_v46  ;;  %263 = vmatpush.msra.mxu2 %v1484_v57  ;;  %v115_v46 = vld [vmem:[#allocation2 + $0x38] sm:$0xff] }
  0x34   :  { %211 = vmatpush.msra.mxu1 %v1403_v47  ;;  %283 = vmatpush.msra.mxu3 %v1494_v60 }
  0x35   :  { %151 = vmatpush.msra.mxu0 %v116_v49  ;;  %264 = vmatpush.msra.mxu2 %v1492_v59 }
  0x36   :  { %212 = vmatpush.msra.mxu1 %v1410_v50  ;;  %152 = vmatmul.f32.vlgmr.msra.gmra.mxu0 %v108_v51 }
  0x37   :  { %213 = vmatmul.f32.vlgmr.msra.gmra.mxu1 %v1250_v52  ;;  %355 = vmatpush.msrb.mxu0 %v1312_v2 }
  0x38   :  { %292 = vmatpush.msrb.mxu1 %v1312_v2  ;;  %265 = vmatpush.msra.mxu2 %v1496_v61 }
  0x39   :  { %356 = vmatpush.msrb.mxu0 %v1315_v3  ;;  %284 = vmatpush.msra.mxu3 %v1498_v62 }
  0x3a   :  { %293 = vmatpush.msrb.mxu1 %v1315_v3  ;;  %266 = vmatpush.msra.mxu2 %v1504_v0 }
  0x3b   :  { %357 = vmatpush.msrb.mxu0 %v1317_v5  ;;  %285 = vmatpush.msra.mxu3 %v1506_v1 }
  0x3c   :  { %294 = vmatpush.msrb.mxu1 %v1317_v5  ;;  %314 = vmatpush.msrb.mxu2 %v1332_v14 }
  0x3d   :  { %358 = vmatpush.msrb.mxu0 %v1320_v7  ;;  %286 = vmatpush.msra.mxu3 %v1515_v4 }
  0x3e   :  { %295 = vmatpush.msrb.mxu1 %v1320_v7  ;;  %155 = vmatmul.f32.gmra.mxu0 %v109_v63 }
  0x3f   :  { %359 = vmatpush.msrb.mxu0 %v1323_v9  ;;  %287 = vmatmul.f32.vlgmr.msra.gmra.mxu3 %v1250_v52 }
  0x40   :  { %296 = vmatpush.msrb.mxu1 %v1323_v9  ;;  %315 = vmatpush.msrb.mxu2 %v1334_v15 }
  0x41   :  { %360 = vmatpush.msrb.mxu0 %v1326_v11  ;;  %334 = vmatpush.msrb.mxu3 %v1336_v16 }
  0x42   :  { %297 = vmatpush.msrb.mxu1 %v1326_v11  ;;  %316 = vmatpush.msrb.mxu2 %v1345_v20 }
  0x43   :  { %361 = vmatpush.msrb.mxu0 %v1329_v13  ;;  %335 = vmatpush.msrb.mxu3 %v1342_v19 }
  0x44   :  { %298 = vmatpush.msrb.mxu1 %v1329_v13  ;;  %317 = vmatpush.msrb.mxu2 %v1354_v24 }
  0x45   :  { %362 = vmatpush.msrb.mxu0 %v1338_v18  ;;  %336 = vmatpush.msrb.mxu3 %v1347_v21 }
  0x46   :  { %299 = vmatpush.msrb.mxu1 %v1338_v18  ;;  %158 = vmatmul.f32.gmra.mxu0 %v110_v6  ;;  %v1612_v6 = vld [vmem:[%s1870_s5] ss:$0 sm:$0xff] }
  0x47   :  { %363 = vmatpush.msrb.mxu0 %v1349_v23  ;;  %318 = vmatpush.msrb.mxu2 %v1363_v28 }
  0x48   :  { %300 = vmatpush.msrb.mxu1 %v1349_v23  ;;  %337 = vmatpush.msrb.mxu3 %v1356_v25 }
  0x49   :  { %364 = vmatpush.msrb.mxu0 %v1358_v27  ;;  %319 = vmatpush.msrb.mxu2 %v1372_v32 }
  0x4a   :  { %301 = vmatpush.msrb.mxu1 %v1358_v27  ;;  %338 = vmatpush.msrb.mxu3 %v1365_v29 }
  0x4b   :  { %365 = vmatpush.msrb.mxu0 %v1367_v31  ;;  %320 = vmatpush.msrb.mxu2 %v1381_v36 }
  0x4c   :  { %302 = vmatpush.msrb.mxu1 %v1367_v31  ;;  %339 = vmatpush.msrb.mxu3 %v1374_v33 }
  0x4d   :  { %366 = vmatpush.msrb.mxu0 %v1376_v35  ;;  %321 = vmatpush.msrb.mxu2 %v1390_v40 }
  0x4e   :  { %303 = vmatpush.msrb.mxu1 %v1376_v35  ;;  %161 = vmatmul.f32.gmra.mxu0 %v111_v8 }
  0x4f   :  { %367 = vmatpush.msrb.mxu0 %v1385_v39  ;;  %340 = vmatpush.msrb.mxu3 %v1383_v37 }
  0x50   :  { %304 = vmatpush.msrb.mxu1 %v1385_v39  ;;  %322 = vmatpush.msrb.mxu2 %v1399_v44 }
  0x51   :  { %368 = vmatpush.msrb.mxu0 %v1394_v43  ;;  %341 = vmatpush.msrb.mxu3 %v1392_v41 }
  0x52   :  { %305 = vmatpush.msrb.mxu1 %v1394_v43  ;;  %323 = vmatpush.msrb.mxu2 %v1408_v48 }
  0x53   :  { %369 = vmatpush.msrb.mxu0 %v1403_v47  ;;  %342 = vmatpush.msrb.mxu3 %v1401_v45 }
  0x54   :  { %306 = vmatpush.msrb.mxu1 %v1403_v47  ;;  %324 = vmatpush.msrb.mxu2 %v1470_v53 }
  0x55   :  { %370 = vmatpush.msrb.mxu0 %v1410_v50  ;;  %343 = vmatpush.msrb.mxu3 %v1472_v54 }
  0x56   :  { %307 = vmatpush.msrb.mxu1 %v1410_v50  ;;  %164 = vmatmul.f32.gmra.mxu0 %v112_v12 }
  0x57   :  { %440 = vmatpush.msra.mxu0 %v1332_v14  ;;  %325 = vmatpush.msrb.mxu2 %v1476_v55 }
  0x58   :  { %377 = vmatpush.msra.mxu1 %v1332_v14  ;;  %344 = vmatpush.msrb.mxu3 %v1478_v56 }
  0x59   :  { %441 = vmatpush.msra.mxu0 %v1334_v15  ;;  %326 = vmatpush.msrb.mxu2 %v1484_v57 }
  0x5a   :  { %378 = vmatpush.msra.mxu1 %v1334_v15  ;;  %345 = vmatpush.msrb.mxu3 %v1486_v58 }
  0x5b   :  { %442 = vmatpush.msra.mxu0 %v1345_v20  ;;  %327 = vmatpush.msrb.mxu2 %v1492_v59 }
  0x5c   :  { %379 = vmatpush.msra.mxu1 %v1345_v20  ;;  %346 = vmatpush.msrb.mxu3 %v1494_v60 }
  0x5d   :  { %443 = vmatpush.msra.mxu0 %v1354_v24  ;;  %328 = vmatpush.msrb.mxu2 %v1496_v61 }
  0x5e   :  { %380 = vmatpush.msra.mxu1 %v1354_v24  ;;  %167 = vmatmul.f32.gmra.mxu0 %v113_v34 }
  0x5f   :  { %444 = vmatpush.msra.mxu0 %v1363_v28  ;;  %347 = vmatpush.msrb.mxu3 %v1498_v62 }
  0x60   :  { %381 = vmatpush.msra.mxu1 %v1363_v28  ;;  %329 = vmatpush.msrb.mxu2 %v1504_v0 }
  0x61   :  { %445 = vmatpush.msra.mxu0 %v1372_v32  ;;  %348 = vmatpush.msrb.mxu3 %v1506_v1 }
  0x62   :  { %382 = vmatpush.msra.mxu1 %v1372_v32 }
  0x63   :  { %446 = vmatpush.msra.mxu0 %v1381_v36  ;;  %349 = vmatpush.msrb.mxu3 %v1515_v4 }
  0x64   :  { %383 = vmatpush.msra.mxu1 %v1381_v36 }
  0x65   :  { %447 = vmatpush.msra.mxu0 %v1390_v40  ;;  %418 = vmatpush.msra.mxu3 %v1312_v2 }
  0x66   :  { %384 = vmatpush.msra.mxu1 %v1390_v40  ;;  %170 = vmatmul.f32.gmra.mxu0 %v114_v42 }
  0x67   :  { %448 = vmatpush.msra.mxu0 %v1399_v44  ;;  %419 = vmatpush.msra.mxu3 %v1315_v3 }
  0x68   :  { %385 = vmatpush.msra.mxu1 %v1399_v44 }
  0x69   :  { %449 = vmatpush.msra.mxu0 %v1408_v48  ;;  %420 = vmatpush.msra.mxu3 %v1317_v5 }
  0x6a   :  { %386 = vmatpush.msra.mxu1 %v1408_v48 }
  0x6b   :  { %450 = vmatpush.msra.mxu0 %v1470_v53  ;;  %421 = vmatpush.msra.mxu3 %v1320_v7 }
  0x6c   :  { %387 = vmatpush.msra.mxu1 %v1470_v53 }
  0x6d   :  { %451 = vmatpush.msra.mxu0 %v1476_v55  ;;  %422 = vmatpush.msra.mxu3 %v1323_v9 }
  0x6e   :  { %388 = vmatpush.msra.mxu1 %v1476_v55  ;;  %173 = vmatmul.f32.gmra.mxu0 %v115_v46 }
  0x6f   :  { %452 = vmatpush.msra.mxu0 %v1484_v57  ;;  %423 = vmatpush.msra.mxu3 %v1326_v11 }
  0x70   :  { %389 = vmatpush.msra.mxu1 %v1484_v57 }
  0x71   :  { %453 = vmatpush.msra.mxu0 %v1492_v59  ;;  %424 = vmatpush.msra.mxu3 %v1329_v13 }
  0x72   :  { %390 = vmatpush.msra.mxu1 %v1492_v59 }
  0x73   :  { %454 = vmatpush.msra.mxu0 %v1496_v61  ;;  %425 = vmatpush.msra.mxu3 %v1338_v18 }
  0x74   :  { %391 = vmatpush.msra.mxu1 %v1496_v61 }
  0x75   :  { %455 = vmatpush.msra.mxu0 %v1504_v0  ;;  %426 = vmatpush.msra.mxu3 %v1349_v23 }
  0x76   :  { %392 = vmatpush.msra.mxu1 %v1504_v0 }
  0x77   :  { %427 = vmatpush.msra.mxu3 %v1358_v27 }
  0x79   :  { %428 = vmatpush.msra.mxu3 %v1367_v31 }
  0x7b   :  { %429 = vmatpush.msra.mxu3 %v1376_v35 }
  0x7d   :  { %430 = vmatpush.msra.mxu3 %v1385_v39 }
  0x7f   :  { %431 = vmatpush.msra.mxu3 %v1394_v43 }
  0x81   :  { %432 = vmatpush.msra.mxu3 %v1403_v47 }
  0x83   :  { %433 = vmatpush.msra.mxu3 %v1410_v50 }
  0xb3   :  { %v153_v17 = vpop.f32.mrf.mxu0 }
  0xb4   :  { %v214_v22 = vpop.f32.mrf.mxu1  ;;  %v154_v26 = vadd.f32 %v1541_v10, %v153_v17 }
  0xb6   :  { %v217_v30 = vadd.f32 %v214_v22, %v154_v26 }
  0xb8   :  { %1057 = vtanh.f32 %v217_v30 }
  0xbb   :  { %v156_v49 = vpop.f32.mrf.mxu0 }
  0xbc   :  { %v157_v51 = vadd.f32 %v1541_v10, %v156_v49 }
  0xbe   :  { %v1058_v38 = vpop.eup %1057 }
  0xbf   :  { %267 = vmatmul.f32.vlgmr.msra.gmra.mxu2 %v1058_v38  ;;  %308 = vmatmul.f32.vlgmr.msrb.gmra.mxu1 %v1058_v38 }
  0xc0   :  { %397 = vmatpush.msra.mxu2 %v1336_v16  ;;  %460 = vmatpush.msrb.mxu1 %v1336_v16 }
  0xc2   :  { %398 = vmatpush.msra.mxu2 %v1342_v19  ;;  %461 = vmatpush.msrb.mxu1 %v1342_v19  ;;  %v288_v12 = vpop.f32.mrf.mxu3 }
  0xc3   :  { %v159_v34 = vpop.f32.mrf.mxu0 }
  0xc4   :  { %399 = vmatpush.msra.mxu2 %v1347_v21  ;;  %462 = vmatpush.msrb.mxu1 %v1347_v21 }
  0xc6   :  { %400 = vmatpush.msra.mxu2 %v1356_v25  ;;  %463 = vmatpush.msrb.mxu1 %v1356_v25 }
  0xc8   :  { %401 = vmatpush.msra.mxu2 %v1365_v29  ;;  %464 = vmatpush.msrb.mxu1 %v1365_v29 }
  0xca   :  { %402 = vmatpush.msra.mxu2 %v1374_v33  ;;  %465 = vmatpush.msrb.mxu1 %v1374_v33 }
  0xcb   :  { %v1666_v38 = vpop.f32.mrf.mxu0 }
  0xcc   :  { %403 = vmatpush.msra.mxu2 %v1383_v37  ;;  %466 = vmatpush.msrb.mxu1 %v1383_v37 }
  0xce   :  { %404 = vmatpush.msra.mxu2 %v1392_v41  ;;  %467 = vmatpush.msrb.mxu1 %v1392_v41 }
  0xd0   :  { %405 = vmatpush.msra.mxu2 %v1401_v45  ;;  %468 = vmatpush.msrb.mxu1 %v1401_v45 }
  0xd2   :  { %406 = vmatpush.msra.mxu2 %v1472_v54  ;;  %469 = vmatpush.msrb.mxu1 %v1472_v54 }
  0xd3   :  { %v1668_v42 = vpop.f32.mrf.mxu0 }
  0xd4   :  { %407 = vmatpush.msra.mxu2 %v1478_v56  ;;  %470 = vmatpush.msrb.mxu1 %v1478_v56 }
  0xd6   :  { %408 = vmatpush.msra.mxu2 %v1486_v58  ;;  %471 = vmatpush.msrb.mxu1 %v1486_v58 }
  0xd8   :  { %409 = vmatpush.msra.mxu2 %v1494_v60  ;;  %472 = vmatpush.msrb.mxu1 %v1494_v60 }
  0xda   :  { %410 = vmatpush.msra.mxu2 %v1498_v62  ;;  %473 = vmatpush.msrb.mxu1 %v1498_v62 }
  0xdb   :  { %v1670_v46 = vpop.f32.mrf.mxu0 }
  0xdc   :  { %411 = vmatpush.msra.mxu2 %v1506_v1  ;;  %474 = vmatpush.msrb.mxu1 %v1506_v1 }
  0xde   :  { %412 = vmatpush.msra.mxu2 %v1515_v4  ;;  %475 = vmatpush.msrb.mxu1 %v1515_v4 }
  0xe3   :  { %v1672_v49 = vpop.f32.mrf.mxu0 }
 0x13c   :  { %v309_v52 = vpop.f32.mrf.mxu1 }
 0x13d   :  { %v312_v63 = vadd.f32 %v309_v52, %v157_v51  ;;  %v1674_v51 = vpop.f32.mrf.mxu0  ;;  %v160_v52 = vadd.f32 %v1541_v10, %v159_v34 }
 0x13e   :  { %1874 = vst [vmem:[#allocation16_spill] sm:$0xff] %v1674_v51 }
 0x13f   :  { %1059 = vtanh.f32 %v312_v63 }
 0x142   :  { %v268_v8 = vpop.f32.mrf.mxu2 }
 0x143   :  { %v269_v17 = vadd.f32 %v1612_v6, %v268_v8 }
 0x145   :  { %v1060_v22 = vpop.eup %1059  ;;  %v289_v26 = vadd.f32 %v288_v12, %v269_v17 }
 0x146   :  { %330 = vmatmul.f32.vlgmr.msrb.gmra.mxu2 %v1060_v22  ;;  %371 = vmatmul.f32.vlgmr.msrb.gmra.mxu0 %v1060_v22 }
 0x147   :  { %1061 = vtanh.f32 %v289_v26  ;;  %481 = vmatpush.msrb.mxu2 %v1312_v2  ;;  %523 = vmatpush.msrb.mxu0 %v1336_v16 }
 0x149   :  { %482 = vmatpush.msrb.mxu2 %v1315_v3  ;;  %524 = vmatpush.msrb.mxu0 %v1342_v19 }
 0x14b   :  { %483 = vmatpush.msrb.mxu2 %v1317_v5  ;;  %525 = vmatpush.msrb.mxu0 %v1347_v21 }
 0x14d   :  { %v1621_v30 = vpop.eup %1061  ;;  %484 = vmatpush.msrb.mxu2 %v1320_v7  ;;  %526 = vmatpush.msrb.mxu0 %v1356_v25 }
 0x14e   :  { %350 = vmatmul.f32.vlgmr.msrb.gmra.mxu3 %v1621_v30 }
 0x14f   :  { %485 = vmatpush.msrb.mxu2 %v1323_v9  ;;  %503 = vmatpush.msrb.mxu3 %v1332_v14 }
 0x150   :  { %527 = vmatpush.msrb.mxu0 %v1365_v29 }
 0x151   :  { %486 = vmatpush.msrb.mxu2 %v1326_v11  ;;  %504 = vmatpush.msrb.mxu3 %v1334_v15 }
 0x152   :  { %528 = vmatpush.msrb.mxu0 %v1374_v33 }
 0x153   :  { %487 = vmatpush.msrb.mxu2 %v1329_v13  ;;  %505 = vmatpush.msrb.mxu3 %v1345_v20 }
 0x154   :  { %529 = vmatpush.msrb.mxu0 %v1383_v37 }
 0x155   :  { %488 = vmatpush.msrb.mxu2 %v1338_v18  ;;  %506 = vmatpush.msrb.mxu3 %v1354_v24 }
 0x156   :  { %530 = vmatpush.msrb.mxu0 %v1392_v41 }
 0x157   :  { %489 = vmatpush.msrb.mxu2 %v1349_v23  ;;  %507 = vmatpush.msrb.mxu3 %v1363_v28 }
 0x158   :  { %531 = vmatpush.msrb.mxu0 %v1401_v45 }
 0x159   :  { %490 = vmatpush.msrb.mxu2 %v1358_v27  ;;  %508 = vmatpush.msrb.mxu3 %v1372_v32 }
 0x15a   :  { %532 = vmatpush.msrb.mxu0 %v1472_v54 }
 0x15b   :  { %491 = vmatpush.msrb.mxu2 %v1367_v31  ;;  %509 = vmatpush.msrb.mxu3 %v1381_v36 }
 0x15c   :  { %533 = vmatpush.msrb.mxu0 %v1478_v56 }
 0x15d   :  { %492 = vmatpush.msrb.mxu2 %v1376_v35  ;;  %510 = vmatpush.msrb.mxu3 %v1390_v40 }
 0x15e   :  { %534 = vmatpush.msrb.mxu0 %v1486_v58 }
 0x15f   :  { %493 = vmatpush.msrb.mxu2 %v1385_v39  ;;  %511 = vmatpush.msrb.mxu3 %v1399_v44 }
 0x160   :  { %535 = vmatpush.msrb.mxu0 %v1494_v60 }
 0x161   :  { %494 = vmatpush.msrb.mxu2 %v1394_v43  ;;  %512 = vmatpush.msrb.mxu3 %v1408_v48 }
 0x162   :  { %536 = vmatpush.msrb.mxu0 %v1498_v62 }
 0x163   :  { %495 = vmatpush.msrb.mxu2 %v1403_v47  ;;  %513 = vmatpush.msrb.mxu3 %v1470_v53 }
 0x164   :  { %537 = vmatpush.msrb.mxu0 %v1506_v1 }
 0x165   :  { %496 = vmatpush.msrb.mxu2 %v1410_v50  ;;  %514 = vmatpush.msrb.mxu3 %v1476_v55 }
 0x166   :  { %538 = vmatpush.msrb.mxu0 %v1515_v4 }
 0x167   :  { %515 = vmatpush.msrb.mxu3 %v1484_v57 }
 0x169   :  { %516 = vmatpush.msrb.mxu3 %v1492_v59 }
 0x16b   :  { %517 = vmatpush.msrb.mxu3 %v1496_v61 }
 0x16d   :  { %518 = vmatpush.msrb.mxu3 %v1504_v0 }
 0x1c3   :  { %v372_v63 = vpop.f32.mrf.mxu0 }
 0x1c4   :  { %v375_v8 = vadd.f32 %v372_v63, %v160_v52 }
 0x1c6   :  { %1063 = vtanh.f32 %v375_v8 }
 0x1c9   :  { %v331_v17 = vpop.f32.mrf.mxu2 }
 0x1ca   :  { %v332_v22 = vadd.f32 %v1612_v6, %v331_v17 }
 0x1cc   :  { %v1064_v12 = vpop.eup %1063 }
 0x1cd   :  { %393 = vmatmul.f32.vlgmr.msra.gmra.mxu1 %v1064_v12  ;;  %434 = vmatmul.f32.vlgmr.msra.gmra.mxu3 %v1064_v12 }
 0x1ce   :  { %544 = vmatpush.msra.mxu1 %v1312_v2  ;;  %586 = vmatpush.msra.mxu3 %v1336_v16 }
 0x1d0   :  { %545 = vmatpush.msra.mxu1 %v1315_v3  ;;  %587 = vmatpush.msra.mxu3 %v1342_v19 }
 0x1d1   :  { %v351_v26 = vpop.f32.mrf.mxu3 }
 0x1d2   :  { %v352_v51 = vadd.f32 %v351_v26, %v332_v22  ;;  %546 = vmatpush.msra.mxu1 %v1317_v5  ;;  %588 = vmatpush.msra.mxu3 %v1347_v21 }
 0x1d4   :  { %1065 = vtanh.f32 %v352_v51  ;;  %547 = vmatpush.msra.mxu1 %v1320_v7  ;;  %589 = vmatpush.msra.mxu3 %v1356_v25  ;;  %v163_v51 = vadd.f32 %v1541_v10, %v1666_v38 }
 0x1d6   :  { %548 = vmatpush.msra.mxu1 %v1323_v9  ;;  %590 = vmatpush.msra.mxu3 %v1365_v29 }
 0x1d8   :  { %549 = vmatpush.msra.mxu1 %v1326_v11  ;;  %591 = vmatpush.msra.mxu3 %v1374_v33 }
 0x1da   :  { %v1690_v34 = vpop.eup %1065  ;;  %550 = vmatpush.msra.mxu1 %v1329_v13  ;;  %592 = vmatpush.msra.mxu3 %v1383_v37 }
 0x1db   :  { %413 = vmatmul.f32.vlgmr.msra.gmra.mxu2 %v1690_v34 }
 0x1dc   :  { %551 = vmatpush.msra.mxu1 %v1338_v18  ;;  %566 = vmatpush.msra.mxu2 %v1332_v14 }
 0x1dd   :  { %593 = vmatpush.msra.mxu3 %v1392_v41 }
 0x1de   :  { %552 = vmatpush.msra.mxu1 %v1349_v23  ;;  %567 = vmatpush.msra.mxu2 %v1334_v15 }
 0x1df   :  { %594 = vmatpush.msra.mxu3 %v1401_v45 }
 0x1e0   :  { %553 = vmatpush.msra.mxu1 %v1358_v27  ;;  %568 = vmatpush.msra.mxu2 %v1345_v20 }
 0x1e1   :  { %595 = vmatpush.msra.mxu3 %v1472_v54 }
 0x1e2   :  { %554 = vmatpush.msra.mxu1 %v1367_v31  ;;  %569 = vmatpush.msra.mxu2 %v1354_v24 }
 0x1e3   :  { %596 = vmatpush.msra.mxu3 %v1478_v56 }
 0x1e4   :  { %555 = vmatpush.msra.mxu1 %v1376_v35  ;;  %570 = vmatpush.msra.mxu2 %v1363_v28 }
 0x1e5   :  { %597 = vmatpush.msra.mxu3 %v1486_v58 }
 0x1e6   :  { %556 = vmatpush.msra.mxu1 %v1385_v39  ;;  %571 = vmatpush.msra.mxu2 %v1372_v32 }
 0x1e7   :  { %598 = vmatpush.msra.mxu3 %v1494_v60 }
 0x1e8   :  { %557 = vmatpush.msra.mxu1 %v1394_v43  ;;  %572 = vmatpush.msra.mxu2 %v1381_v36 }
 0x1e9   :  { %599 = vmatpush.msra.mxu3 %v1498_v62 }
 0x1ea   :  { %558 = vmatpush.msra.mxu1 %v1403_v47  ;;  %573 = vmatpush.msra.mxu2 %v1390_v40 }
 0x1eb   :  { %600 = vmatpush.msra.mxu3 %v1506_v1 }
 0x1ec   :  { %559 = vmatpush.msra.mxu1 %v1410_v50  ;;  %574 = vmatpush.msra.mxu2 %v1399_v44 }
 0x1ed   :  { %601 = vmatpush.msra.mxu3 %v1515_v4 }
 0x1ee   :  { %575 = vmatpush.msra.mxu2 %v1408_v48 }
 0x1f0   :  { %576 = vmatpush.msra.mxu2 %v1470_v53 }
 0x1f2   :  { %577 = vmatpush.msra.mxu2 %v1476_v55 }
 0x1f4   :  { %578 = vmatpush.msra.mxu2 %v1484_v57 }
 0x1f6   :  { %579 = vmatpush.msra.mxu2 %v1492_v59 }
 0x1f8   :  { %580 = vmatpush.msra.mxu2 %v1496_v61 }
 0x1fa   :  { %581 = vmatpush.msra.mxu2 %v1504_v0 }
 0x24a   :  { %v394_v12 = vpop.f32.mrf.mxu1 }
 0x24b   :  { %v395_v17 = vadd.f32 %v1612_v6, %v394_v12 }
 0x250   :  { %v435_v52 = vpop.f32.mrf.mxu3 }
 0x251   :  { %v438_v63 = vadd.f32 %v435_v52, %v163_v51  ;;  %v166_v51 = vadd.f32 %v1541_v10, %v1668_v42 }
 0x253   :  { %1067 = vtanh.f32 %v438_v63 }
 0x259   :  { %v1068_v8 = vpop.eup %1067 }
 0x25a   :  { %456 = vmatmul.f32.vlgmr.msra.gmra.mxu0 %v1068_v8  ;;  %497 = vmatmul.f32.vlgmr.msrb.gmra.mxu2 %v1068_v8 }
 0x25b   :  { %607 = vmatpush.msra.mxu0 %v1312_v2  ;;  %649 = vmatpush.msrb.mxu2 %v1336_v16 }
 0x25d   :  { %608 = vmatpush.msra.mxu0 %v1315_v3  ;;  %650 = vmatpush.msrb.mxu2 %v1342_v19 }
 0x25e   :  { %v414_v22 = vpop.f32.mrf.mxu2 }
 0x25f   :  { %v415_v26 = vadd.f32 %v414_v22, %v395_v17  ;;  %609 = vmatpush.msra.mxu0 %v1317_v5  ;;  %651 = vmatpush.msrb.mxu2 %v1347_v21 }
 0x261   :  { %1069 = vtanh.f32 %v415_v26  ;;  %610 = vmatpush.msra.mxu0 %v1320_v7  ;;  %652 = vmatpush.msrb.mxu2 %v1356_v25 }
 0x263   :  { %611 = vmatpush.msra.mxu0 %v1323_v9  ;;  %653 = vmatpush.msrb.mxu2 %v1365_v29 }
 0x265   :  { %612 = vmatpush.msra.mxu0 %v1326_v11  ;;  %654 = vmatpush.msrb.mxu2 %v1374_v33 }
 0x267   :  { %v1744_v38 = vpop.eup %1069  ;;  %613 = vmatpush.msra.mxu0 %v1329_v13  ;;  %655 = vmatpush.msrb.mxu2 %v1383_v37 }
 0x268   :  { %476 = vmatmul.f32.vlgmr.msrb.gmra.mxu1 %v1744_v38 }
 0x269   :  { %614 = vmatpush.msra.mxu0 %v1338_v18  ;;  %656 = vmatpush.msrb.mxu2 %v1392_v41 }
 0x26a   :  { %629 = vmatpush.msrb.mxu1 %v1332_v14 }
 0x26b   :  { %615 = vmatpush.msra.mxu0 %v1349_v23  ;;  %657 = vmatpush.msrb.mxu2 %v1401_v45 }
 0x26c   :  { %630 = vmatpush.msrb.mxu1 %v1334_v15 }
 0x26d   :  { %616 = vmatpush.msra.mxu0 %v1358_v27  ;;  %658 = vmatpush.msrb.mxu2 %v1472_v54 }
 0x26e   :  { %631 = vmatpush.msrb.mxu1 %v1345_v20 }
 0x26f   :  { %617 = vmatpush.msra.mxu0 %v1367_v31  ;;  %659 = vmatpush.msrb.mxu2 %v1478_v56 }
 0x270   :  { %632 = vmatpush.msrb.mxu1 %v1354_v24 }
 0x271   :  { %618 = vmatpush.msra.mxu0 %v1376_v35  ;;  %660 = vmatpush.msrb.mxu2 %v1486_v58 }
 0x272   :  { %633 = vmatpush.msrb.mxu1 %v1363_v28 }
 0x273   :  { %619 = vmatpush.msra.mxu0 %v1385_v39  ;;  %661 = vmatpush.msrb.mxu2 %v1494_v60 }
 0x274   :  { %634 = vmatpush.msrb.mxu1 %v1372_v32 }
 0x275   :  { %620 = vmatpush.msra.mxu0 %v1394_v43  ;;  %662 = vmatpush.msrb.mxu2 %v1498_v62 }
 0x276   :  { %635 = vmatpush.msrb.mxu1 %v1381_v36 }
 0x277   :  { %621 = vmatpush.msra.mxu0 %v1403_v47  ;;  %663 = vmatpush.msrb.mxu2 %v1506_v1 }
 0x278   :  { %636 = vmatpush.msrb.mxu1 %v1390_v40 }
 0x279   :  { %622 = vmatpush.msra.mxu0 %v1410_v50  ;;  %664 = vmatpush.msrb.mxu2 %v1515_v4 }
 0x27a   :  { %637 = vmatpush.msrb.mxu1 %v1399_v44 }
 0x27c   :  { %638 = vmatpush.msrb.mxu1 %v1408_v48 }
 0x27e   :  { %639 = vmatpush.msrb.mxu1 %v1470_v53 }
 0x280   :  { %640 = vmatpush.msrb.mxu1 %v1476_v55 }
 0x282   :  { %641 = vmatpush.msrb.mxu1 %v1484_v57 }
 0x284   :  { %642 = vmatpush.msrb.mxu1 %v1492_v59 }
 0x286   :  { %643 = vmatpush.msrb.mxu1 %v1496_v61 }
 0x288   :  { %644 = vmatpush.msrb.mxu1 %v1504_v0 }
 0x2d7   :  { %v457_v8 = vpop.f32.mrf.mxu0 }
 0x2d8   :  { %v458_v12 = vadd.f32 %v1612_v6, %v457_v8 }
 0x2dd   :  { %v498_v52 = vpop.f32.mrf.mxu2 }
 0x2de   :  { %v501_v63 = vadd.f32 %v498_v52, %v166_v51 }
 0x2e0   :  { %1071 = vtanh.f32 %v501_v63  ;;  %v825_v63 = vld [vmem:[#allocation10 + $0x2e0] sm:$0xff] }
 0x2e5   :  { %v477_v17 = vpop.f32.mrf.mxu1 }
 0x2e6   :  { %v1072_v22 = vpop.eup %1071  ;;  %v478_v26 = vadd.f32 %v477_v17, %v458_v12  ;;  %v824_v12 = vld [vmem:[#allocation10 + $0x2d8] sm:$0xff] }
 0x2e7   :  { %519 = vmatmul.f32.vlgmr.msrb.gmra.mxu3 %v1072_v22  ;;  %560 = vmatmul.f32.vlgmr.msra.gmra.mxu1 %v1072_v22  ;;  %v812_v17 = vld [vmem:[#allocation10 + $0x278] sm:$0xff]  ;;  %v821_v22 = vld [vmem:[#allocation10 + $0x2c0] sm:$0xff] }
 0x2e8   :  { %1073 = vtanh.f32 %v478_v26  ;;  %670 = vmatpush.msrb.mxu3 %v1312_v2  ;;  %712 = vmatpush.msra.mxu1 %v1336_v16  ;;  %v169_v2 = vadd.f32 %v1541_v10, %v1670_v46  ;;  %v747_v16 = vld [vmem:[#allocation10 + $0x70] sm:$0xff]  ;;  %v826_v46 = vld [vmem:[#allocation10 + $0x2e8] sm:$0xff] }
 0x2ea   :  { %671 = vmatpush.msrb.mxu3 %v1315_v3  ;;  %713 = vmatpush.msra.mxu1 %v1342_v19  ;;  %v745_v19 = vld [vmem:[#allocation10 + $0x60] sm:$0xff] }
 0x2ec   :  { %672 = vmatpush.msrb.mxu3 %v1317_v5  ;;  %714 = vmatpush.msra.mxu1 %v1347_v21 }
 0x2ee   :  { %v1792_v42 = vpop.eup %1073  ;;  %673 = vmatpush.msrb.mxu3 %v1320_v7  ;;  %715 = vmatpush.msra.mxu1 %v1356_v25  ;;  %v761_v25 = vld [vmem:[#allocation10 + $0xe0] sm:$0xff] }
 0x2ef   :  { %539 = vmatmul.f32.vlgmr.msrb.gmra.mxu0 %v1792_v42 }
 0x2f0   :  { %674 = vmatpush.msrb.mxu3 %v1323_v9  ;;  %692 = vmatpush.msrb.mxu0 %v1332_v14 }
 0x2f1   :  { %716 = vmatpush.msra.mxu1 %v1365_v29  ;;  %v758_v29 = vld [vmem:[#allocation10 + $0xc8] sm:$0xff] }
 0x2f2   :  { %675 = vmatpush.msrb.mxu3 %v1326_v11  ;;  %693 = vmatpush.msrb.mxu0 %v1334_v15 }
 0x2f3   :  { %717 = vmatpush.msra.mxu1 %v1374_v33  ;;  %v755_v33 = vld [vmem:[#allocation10 + $0xb0] sm:$0xff] }
 0x2f4   :  { %676 = vmatpush.msrb.mxu3 %v1329_v13  ;;  %694 = vmatpush.msrb.mxu0 %v1345_v20  ;;  %v748_v13 = vld [vmem:[#allocation10 + $0x78] sm:$0xff] }
 0x2f5   :  { %718 = vmatpush.msra.mxu1 %v1383_v37  ;;  %v764_v20 = vld [vmem:[#allocation10 + $0xf8] sm:$0xff]  ;;  %v753_v37 = vld [vmem:[#allocation10 + $0xa0] sm:$0xff] }
 0x2f6   :  { %677 = vmatpush.msrb.mxu3 %v1338_v18  ;;  %695 = vmatpush.msrb.mxu0 %v1354_v24  ;;  %v746_v18 = vld [vmem:[#allocation10 + $0x68] sm:$0xff] }
 0x2f7   :  { %719 = vmatpush.msra.mxu1 %v1392_v41  ;;  %v762_v24 = vld [vmem:[#allocation10 + $0xe8] sm:$0xff] }
 0x2f8   :  { %678 = vmatpush.msrb.mxu3 %v1349_v23  ;;  %696 = vmatpush.msrb.mxu0 %v1363_v28  ;;  %v763_v23 = vld [vmem:[#allocation10 + $0xf0] sm:$0xff]  ;;  %v742_v41 = vld [vmem:[#allocation10 + $0x48] sm:$0xff] }
 0x2f9   :  { %720 = vmatpush.msra.mxu1 %v1401_v45  ;;  %v759_v28 = vld [vmem:[#allocation10 + $0xd0] sm:$0xff]  ;;  %v750_v45 = vld [vmem:[#allocation10 + $0x88] sm:$0xff] }
 0x2fa   :  { %679 = vmatpush.msrb.mxu3 %v1358_v27  ;;  %697 = vmatpush.msrb.mxu0 %v1372_v32  ;;  %v760_v27 = vld [vmem:[#allocation10 + $0xd8] sm:$0xff] }
 0x2fb   :  { %721 = vmatpush.msra.mxu1 %v1472_v54  ;;  %v756_v32 = vld [vmem:[#allocation10 + $0xb8] sm:$0xff]  ;;  %v737_v54 = vld [vmem:[#allocation10 + $0x20] sm:$0xff] }
 0x2fc   :  { %680 = vmatpush.msrb.mxu3 %v1367_v31  ;;  %698 = vmatpush.msrb.mxu0 %v1381_v36  ;;  %v757_v31 = vld [vmem:[#allocation10 + $0xc0] sm:$0xff]  ;;  %v744_v36 = vld [vmem:[#allocation10 + $0x58] sm:$0xff] }
 0x2fd   :  { %722 = vmatpush.msra.mxu1 %v1478_v56  ;;  %v735_v56 = vld [vmem:[#allocation10 + $0x10] sm:$0xff] }
 0x2fe   :  { %681 = vmatpush.msrb.mxu3 %v1376_v35  ;;  %699 = vmatpush.msrb.mxu0 %v1390_v40  ;;  %v754_v35 = vld [vmem:[#allocation10 + $0xa8] sm:$0xff]  ;;  %v752_v40 = vld [vmem:[#allocation10 + $0x98] sm:$0xff] }
 0x2ff   :  { %723 = vmatpush.msra.mxu1 %v1486_v58  ;;  %v733_v58 = vld [vmem:[#allocation10] sm:$0xff] }
 0x300   :  { %682 = vmatpush.msrb.mxu3 %v1385_v39  ;;  %700 = vmatpush.msrb.mxu0 %v1399_v44  ;;  %v743_v39 = vld [vmem:[#allocation10 + $0x50] sm:$0xff]  ;;  %v741_v44 = vld [vmem:[#allocation10 + $0x40] sm:$0xff] }
 0x301   :  { %724 = vmatpush.msra.mxu1 %v1494_v60 }
 0x302   :  { %683 = vmatpush.msrb.mxu3 %v1394_v43  ;;  %701 = vmatpush.msrb.mxu0 %v1408_v48  ;;  %v751_v43 = vld [vmem:[#allocation10 + $0x90] sm:$0xff]  ;;  %v749_v48 = vld [vmem:[#allocation10 + $0x80] sm:$0xff] }
 0x303   :  { %725 = vmatpush.msra.mxu1 %v1498_v62  ;;  %v828_v62 = vld [vmem:[#allocation10 + $0x2f8] sm:$0xff] }
 0x304   :  { %684 = vmatpush.msrb.mxu3 %v1403_v47  ;;  %702 = vmatpush.msrb.mxu0 %v1470_v53  ;;  %v740_v47 = vld [vmem:[#allocation10 + $0x38] sm:$0xff]  ;;  %v738_v53 = vld [vmem:[#allocation10 + $0x28] sm:$0xff] }
 0x305   :  { %726 = vmatpush.msra.mxu1 %v1506_v1 }
 0x306   :  { %685 = vmatpush.msrb.mxu3 %v1410_v50  ;;  %703 = vmatpush.msrb.mxu0 %v1476_v55  ;;  %v739_v50 = vld [vmem:[#allocation10 + $0x30] sm:$0xff]  ;;  %v736_v55 = vld [vmem:[#allocation10 + $0x18] sm:$0xff] }
 0x307   :  { %727 = vmatpush.msra.mxu1 %v1515_v4  ;;  %v827_v4 = vld [vmem:[#allocation10 + $0x2f0] sm:$0xff] }
 0x308   :  { %704 = vmatpush.msrb.mxu0 %v1484_v57  ;;  %v734_v57 = vld [vmem:[#allocation10 + $0x8] sm:$0xff] }
 0x30a   :  { %705 = vmatpush.msrb.mxu0 %v1492_v59  ;;  %v172_v59 = vadd.f32 %v1541_v10, %v1672_v49  ;;  %v823_v10 = vld [vmem:[#allocation10 + $0x2d0] sm:$0xff]  ;;  %v822_v49 = vld [vmem:[#allocation10 + $0x2c8] sm:$0xff] }
 0x30c   :  { %706 = vmatpush.msrb.mxu0 %v1496_v61 }
 0x30e   :  { %707 = vmatpush.msrb.mxu0 %v1504_v0 }
 0x364   :  { %v561_v3 = vpop.f32.mrf.mxu1 }
 0x365   :  { %v564_v5 = vadd.f32 %v561_v3, %v169_v2  ;;  %v811_v2 = vld [vmem:[#allocation10 + $0x270] sm:$0xff]  ;;  %v820_v3 = vld [vmem:[#allocation10 + $0x2b8] sm:$0xff] }
 0x367   :  { %1075 = vtanh.f32 %v564_v5  ;;  %v780_v5 = vld [vmem:[#allocation10 + $0x178] sm:$0xff] }
 0x36a   :  { %v520_v7 = vpop.f32.mrf.mxu3 }
 0x36b   :  { %v521_v9 = vadd.f32 %v1612_v6, %v520_v7  ;;  %v779_v7 = vld [vmem:[#allocation10 + $0x170] sm:$0xff] }
 0x36c   :  { %v540_v11 = vpop.f32.mrf.mxu0 }
 0x36d   :  { %v1076_v14 = vpop.eup %1075  ;;  %v541_v15 = vadd.f32 %v540_v11, %v521_v9  ;;  %v810_v9 = vld [vmem:[#allocation10 + $0x268] sm:$0xff]  ;;  %v819_v11 = vld [vmem:[#allocation10 + $0x2b0] sm:$0xff] }
 0x36e   :  { %582 = vmatmul.f32.vlgmr.msra.gmra.mxu2 %v1076_v14  ;;  %623 = vmatmul.f32.vlgmr.msra.gmra.mxu0 %v1076_v14  ;;  %v818_v14 = vld [vmem:[#allocation10 + $0x2a8] sm:$0xff] }
 0x36f   :  { %1077 = vtanh.f32 %v541_v15  ;;  %865 = vmatpush.msra.mxu2 %v748_v13  ;;  %905 = vmatpush.msra.mxu0 %v780_v5  ;;  %v809_v13 = vld [vmem:[#allocation10 + $0x260] sm:$0xff]  ;;  %v843_v5 = vld [vmem:[#allocation10 + $0x370] sm:$0xff] }
 0x370   :  { %v777_v15 = vld [vmem:[#allocation10 + $0x160] sm:$0xff] }
 0x371   :  { %866 = vmatpush.msra.mxu2 %v747_v16  ;;  %906 = vmatpush.msra.mxu0 %v779_v7  ;;  %v808_v16 = vld [vmem:[#allocation10 + $0x258] sm:$0xff]  ;;  %v842_v7 = vld [vmem:[#allocation10 + $0x368] sm:$0xff] }
 0x373   :  { %867 = vmatpush.msra.mxu2 %v746_v18  ;;  %v817_v18 = vld [vmem:[#allocation10 + $0x2a0] sm:$0xff] }
 0x375   :  { %v1840_v21 = vpop.eup %1077  ;;  %868 = vmatpush.msra.mxu2 %v745_v19  ;;  %v776_v19 = vld [vmem:[#allocation10 + $0x158] sm:$0xff] }
 0x376   :  { %602 = vmatmul.f32.vlgmr.msra.gmra.mxu3 %v1840_v21 }
 0x377   :  { %885 = vmatpush.msra.mxu3 %v764_v20  ;;  %869 = vmatpush.msra.mxu2 %v744_v36  ;;  %v807_v20 = vld [vmem:[#allocation10 + $0x250] sm:$0xff]  ;;  %v802_v36 = vld [vmem:[#allocation10 + $0x228] sm:$0xff] }
 0x379   :  { %886 = vmatpush.msra.mxu3 %v763_v23  ;;  %870 = vmatpush.msra.mxu2 %v743_v39  ;;  %v816_v23 = vld [vmem:[#allocation10 + $0x298] sm:$0xff] }
 0x37a   :  { %v800_v39 = vld [vmem:[#allocation10 + $0x218] sm:$0xff] }
 0x37b   :  { %887 = vmatpush.msra.mxu3 %v762_v24  ;;  %871 = vmatpush.msra.mxu2 %v742_v41  ;;  %v775_v24 = vld [vmem:[#allocation10 + $0x150] sm:$0xff]  ;;  %v798_v41 = vld [vmem:[#allocation10 + $0x208] sm:$0xff] }
 0x37d   :  { %888 = vmatpush.msra.mxu3 %v761_v25  ;;  %872 = vmatpush.msra.mxu2 %v741_v44  ;;  %v806_v25 = vld [vmem:[#allocation10 + $0x248] sm:$0xff]  ;;  %v772_v44 = vld [vmem:[#allocation10 + $0x138] sm:$0xff] }
 0x37f   :  { %889 = vmatpush.msra.mxu3 %v760_v27  ;;  %873 = vmatpush.msra.mxu2 %v740_v47  ;;  %v815_v27 = vld [vmem:[#allocation10 + $0x290] sm:$0xff]  ;;  %v770_v47 = vld [vmem:[#allocation10 + $0x128] sm:$0xff] }
 0x381   :  { %890 = vmatpush.msra.mxu3 %v759_v28  ;;  %874 = vmatpush.msra.mxu2 %v739_v50  ;;  %v774_v28 = vld [vmem:[#allocation10 + $0x148] sm:$0xff]  ;;  %v796_v50 = vld [vmem:[#allocation10 + $0x1f8] sm:$0xff] }
 0x383   :  { %891 = vmatpush.msra.mxu3 %v758_v29  ;;  %875 = vmatpush.msra.mxu2 %v738_v53  ;;  %v805_v29 = vld [vmem:[#allocation10 + $0x240] sm:$0xff]  ;;  %v768_v53 = vld [vmem:[#allocation10 + $0x118] sm:$0xff] }
 0x385   :  { %892 = vmatpush.msra.mxu3 %v757_v31  ;;  %876 = vmatpush.msra.mxu2 %v737_v54  ;;  %v814_v31 = vld [vmem:[#allocation10 + $0x288] sm:$0xff]  ;;  %v795_v54 = vld [vmem:[#allocation10 + $0x1f0] sm:$0xff] }
 0x387   :  { %893 = vmatpush.msra.mxu3 %v756_v32  ;;  %877 = vmatpush.msra.mxu2 %v736_v55  ;;  %v773_v32 = vld [vmem:[#allocation10 + $0x140] sm:$0xff]  ;;  %v767_v55 = vld [vmem:[#allocation10 + $0x110] sm:$0xff] }
 0x389   :  { %894 = vmatpush.msra.mxu3 %v755_v33  ;;  %878 = vmatpush.msra.mxu2 %v735_v56  ;;  %v804_v33 = vld [vmem:[#allocation10 + $0x238] sm:$0xff]  ;;  %v794_v56 = vld [vmem:[#allocation10 + $0x1e8] sm:$0xff] }
 0x38b   :  { %895 = vmatpush.msra.mxu3 %v754_v35  ;;  %879 = vmatpush.msra.mxu2 %v734_v57  ;;  %v803_v35 = vld [vmem:[#allocation10 + $0x230] sm:$0xff]  ;;  %v766_v57 = vld [vmem:[#allocation10 + $0x108] sm:$0xff] }
 0x38d   :  { %896 = vmatpush.msra.mxu3 %v753_v37  ;;  %880 = vmatpush.msra.mxu2 %v733_v58  ;;  %v801_v37 = vld [vmem:[#allocation10 + $0x220] sm:$0xff] }
 0x38e   :  { %v793_v58 = vld [vmem:[#allocation10 + $0x1e0] sm:$0xff] }
 0x38f   :  { %897 = vmatpush.msra.mxu3 %v752_v40  ;;  %v799_v40 = vld [vmem:[#allocation10 + $0x210] sm:$0xff] }
 0x391   :  { %898 = vmatpush.msra.mxu3 %v751_v43  ;;  %v797_v43 = vld [vmem:[#allocation10 + $0x200] sm:$0xff] }
 0x393   :  { %899 = vmatpush.msra.mxu3 %v750_v45  ;;  %v771_v45 = vld [vmem:[#allocation10 + $0x130] sm:$0xff] }
 0x395   :  { %900 = vmatpush.msra.mxu3 %v749_v48  ;;  %v769_v48 = vld [vmem:[#allocation10 + $0x120] sm:$0xff] }
 0x3eb   :  { %v624_v60 = vpop.f32.mrf.mxu0 }
 0x3ec   :  { %v627_v61 = vadd.f32 %v624_v60, %v172_v59  ;;  %v792_v59 = vld [vmem:[#allocation10 + $0x1d8] sm:$0xff]  ;;  %v791_v60 = vld [vmem:[#allocation10 + $0x1d0] sm:$0xff] }
 0x3ee   :  { %1079 = vtanh.f32 %v627_v61  ;;  %v790_v61 = vld [vmem:[#allocation10 + $0x1c8] sm:$0xff] }
 0x3f1   :  { %v583_v1 = vpop.f32.mrf.mxu2 }
 0x3f2   :  { %v584_v51 = vadd.f32 %v1612_v6, %v583_v1  ;;  %v787_v1 = vld [vmem:[#allocation10 + $0x1b0] sm:$0xff] }
 0x3f4   :  { %v1080_v0 = vpop.eup %1079 }
 0x3f5   :  { %645 = vmatmul.f32.vlgmr.msrb.gmra.mxu1 %v1080_v0  ;;  %686 = vmatmul.f32.vlgmr.msrb.gmra.mxu3 %v1080_v0  ;;  %v788_v0 = vld [vmem:[#allocation10 + $0x1b8] sm:$0xff] }
 0x3f6   :  { %965 = vmatpush.msrb.mxu3 %v828_v62  ;;  %925 = vmatpush.msrb.mxu1 %v796_v50  ;;  %v789_v62 = vld [vmem:[#allocation10 + $0x1c0] sm:$0xff] }
 0x3f7   :  { %v1090_v50 = vld [vmem:[%s1870_s5] ss:$0 sm:$0xff]  ;;  %s1251_s5 = smov [#allocation11]  }
 0x3f8   :  { %966 = vmatpush.msrb.mxu3 %v827_v4  ;;  %926 = vmatpush.msrb.mxu1 %v795_v54  ;;  %v786_v4 = vld [vmem:[#allocation10 + $0x1a8] sm:$0xff]  ;;  %s1031_s14 = sshll.u32 %s1251_s5, 4  ;;  %s1032_s14 = int_to_ptr.vmem [resolvable:$true] %s1031_s14 }
 0x3f9   :  { %v603_v52 = vpop.f32.mrf.mxu3 }
 0x3fa   :  { %v604_v8 = vadd.f32 %v603_v52, %v584_v51  ;;  %967 = vmatpush.msrb.mxu3 %v826_v46  ;;  %927 = vmatpush.msrb.mxu1 %v794_v56  ;;  %v785_v46 = vld [vmem:[#allocation10 + $0x1a0] sm:$0xff]  ;;  %v784_v51 = vld [vmem:[#allocation10 + $0x198] sm:$0xff]  ;;  %v783_v52 = vld [vmem:[#allocation10 + $0x190] sm:$0xff] }
 0x3fc   :  { %1081 = vtanh.f32 %v604_v8  ;;  %968 = vmatpush.msrb.mxu3 %v825_v63  ;;  %928 = vmatpush.msrb.mxu1 %v793_v58  ;;  %v782_v63 = vld [vmem:[#allocation10 + $0x188] sm:$0xff]  ;;  %v1089_v8 = vld [vmem:[%s1867_s2] ss:$0 sm:$0xff] }
 0x3fd   :  { %901 = vmatmul.f32.vlgmr.msra.gmra.mxu3 %v1690_v34  ;;  %v778_v34 = vld [vmem:[#allocation10 + $0x168] sm:$0xff] }
 0x3fe   :  { %969 = vmatpush.msrb.mxu3 %v824_v12  ;;  %907 = vmatpush.msra.mxu0 %v778_v34  ;;  %v1875_v12 = vld [vmem:[#allocation16_spill] sm:$0xff]  ;;  %v841_v34 = vld [vmem:[#allocation10 + $0x360] sm:$0xff] }
 0x3ff   :  { %929 = vmatpush.msrb.mxu1 %v792_v59 }
 0x400   :  { %970 = vmatpush.msrb.mxu3 %v823_v10  ;;  %908 = vmatpush.msra.mxu0 %v777_v15  ;;  %v175_v10 = vadd.f32 %v1089_v8, %v1875_v12  ;;  %v839_v15 = vld [vmem:[#allocation10 + $0x350] sm:$0xff] }
 0x401   :  { %930 = vmatpush.msrb.mxu1 %v791_v60 }
 0x402   :  { %v1082_v26 = vpop.eup %1081  ;;  %971 = vmatpush.msrb.mxu3 %v822_v49  ;;  %909 = vmatpush.msra.mxu0 %v776_v19  ;;  %v781_v49 = vld [vmem:[#allocation10 + $0x180] sm:$0xff]  ;;  %v860_v19 = vld [vmem:[#allocation10 + $0x3f8] sm:$0xff] }
 0x403   :  { %665 = vmatmul.f32.vlgmr.msrb.gmra.mxu2 %v1082_v26  ;;  %931 = vmatpush.msrb.mxu1 %v790_v61 }
 0x404   :  { %945 = vmatpush.msrb.mxu2 %v812_v17  ;;  %972 = vmatpush.msrb.mxu3 %v821_v22 }
 0x405   :  { %910 = vmatpush.msra.mxu0 %v775_v24  ;;  %932 = vmatpush.msrb.mxu1 %v789_v62  ;;  %v835_v24 = vld [vmem:[#allocation10 + $0x330] sm:$0xff] }
 0x406   :  { %946 = vmatpush.msrb.mxu2 %v811_v2  ;;  %973 = vmatpush.msrb.mxu3 %v820_v3 }
 0x407   :  { %911 = vmatpush.msra.mxu0 %v774_v28  ;;  %933 = vmatpush.msrb.mxu1 %v788_v0  ;;  %v857_v28 = vld [vmem:[#allocation10 + $0x3e0] sm:$0xff] }
 0x408   :  { %947 = vmatpush.msrb.mxu2 %v810_v9  ;;  %974 = vmatpush.msrb.mxu3 %v819_v11 }
 0x409   :  { %912 = vmatpush.msra.mxu0 %v773_v32  ;;  %934 = vmatpush.msrb.mxu1 %v787_v1  ;;  %v830_v32 = vld [vmem:[#allocation10 + $0x308] sm:$0xff] }
 0x40a   :  { %948 = vmatpush.msrb.mxu2 %v809_v13  ;;  %975 = vmatpush.msrb.mxu3 %v818_v14  ;;  %v840_v14 = vld [vmem:[#allocation10 + $0x358] sm:$0xff] }
 0x40b   :  { %881 = vmatmul.f32.vlgmr.msra.gmra.mxu2 %v1621_v30  ;;  %v813_v30 = vld [vmem:[#allocation10 + $0x280] sm:$0xff]  ;;  %913 = vmatpush.msra.mxu0 %v772_v44  ;;  %v847_v44 = vld [vmem:[#allocation10 + $0x390] sm:$0xff] }
 0x40c   :  { %949 = vmatpush.msrb.mxu2 %v808_v16  ;;  %976 = vmatpush.msrb.mxu3 %v817_v18  ;;  %v838_v16 = vld [vmem:[#allocation10 + $0x348] sm:$0xff]  ;;  %v837_v18 = vld [vmem:[#allocation10 + $0x340] sm:$0xff] }
 0x40d   :  { %914 = vmatpush.msra.mxu0 %v771_v45  ;;  %935 = vmatpush.msrb.mxu1 %v786_v4  ;;  %v846_v45 = vld [vmem:[#allocation10 + $0x388] sm:$0xff] }
 0x40e   :  { %950 = vmatpush.msrb.mxu2 %v807_v20  ;;  %977 = vmatpush.msrb.mxu3 %v816_v23  ;;  %v859_v23 = vld [vmem:[#allocation10 + $0x3f0] sm:$0xff] }
 0x40f   :  { %915 = vmatpush.msra.mxu0 %v770_v47  ;;  %936 = vmatpush.msrb.mxu1 %v785_v46  ;;  %v845_v47 = vld [vmem:[#allocation10 + $0x380] sm:$0xff] }
 0x410   :  { %951 = vmatpush.msrb.mxu2 %v806_v25  ;;  %978 = vmatpush.msrb.mxu3 %v815_v27  ;;  %v858_v25 = vld [vmem:[#allocation10 + $0x3e8] sm:$0xff] }
 0x411   :  { %916 = vmatpush.msra.mxu0 %v769_v48  ;;  %937 = vmatpush.msrb.mxu1 %v784_v51  ;;  %v834_v27 = vld [vmem:[#allocation10 + $0x328] sm:$0xff] }
 0x412   :  { %952 = vmatpush.msrb.mxu2 %v805_v29  ;;  %979 = vmatpush.msrb.mxu3 %v814_v31  ;;  %v832_v29 = vld [vmem:[#allocation10 + $0x318] sm:$0xff]  ;;  %v831_v31 = vld [vmem:[#allocation10 + $0x310] sm:$0xff] }
 0x413   :  { %917 = vmatpush.msra.mxu0 %v768_v53  ;;  %938 = vmatpush.msrb.mxu1 %v783_v52 }
 0x414   :  { %953 = vmatpush.msrb.mxu2 %v804_v33  ;;  %980 = vmatpush.msrb.mxu3 %v813_v30  ;;  %v829_v33 = vld [vmem:[#allocation10 + $0x300] sm:$0xff]  ;;  %v856_v30 = vld [vmem:[#allocation10 + $0x3d8] sm:$0xff] }
 0x415   :  { %981 = vmatmul.f32.vlgmr.msrb.gmra.mxu3 %v1082_v26  ;;  %918 = vmatpush.msra.mxu0 %v767_v55  ;;  %v844_v26 = vld [vmem:[#allocation10 + $0x378] sm:$0xff] }
 0x416   :  { %954 = vmatpush.msrb.mxu2 %v803_v35  ;;  %939 = vmatpush.msrb.mxu1 %v782_v63  ;;  %v855_v35 = vld [vmem:[#allocation10 + $0x3d0] sm:$0xff] }
 0x417   :  { %919 = vmatpush.msra.mxu0 %v766_v57  ;;  %v1056_v57 = vld [vmem:[%s1872_s7] ss:$0 sm:$0xff] }
 0x418   :  { %955 = vmatpush.msrb.mxu2 %v802_v36  ;;  %940 = vmatpush.msrb.mxu1 %v781_v49  ;;  %v854_v36 = vld [vmem:[#allocation10 + $0x3c8] sm:$0xff] }
 0x41a   :  { %956 = vmatpush.msrb.mxu2 %v801_v37  ;;  %v853_v37 = vld [vmem:[#allocation10 + $0x3c0] sm:$0xff] }
 0x41c   :  { %957 = vmatpush.msrb.mxu2 %v800_v39  ;;  %v852_v39 = vld [vmem:[#allocation10 + $0x3b8] sm:$0xff] }
 0x41e   :  { %958 = vmatpush.msrb.mxu2 %v799_v40  ;;  %v850_v40 = vld [vmem:[#allocation10 + $0x3a8] sm:$0xff] }
 0x420   :  { %959 = vmatpush.msrb.mxu2 %v798_v41  ;;  %v849_v41 = vld [vmem:[#allocation10 + $0x3a0] sm:$0xff] }
 0x422   :  { %960 = vmatpush.msrb.mxu2 %v797_v43  ;;  %v848_v43 = vld [vmem:[#allocation10 + $0x398] sm:$0xff] }
 0x423   :  { %961 = vmatmul.f32.vlgmr.msrb.gmra.mxu2 %v1840_v21  ;;  %v765_v21 = vld [vmem:[#allocation10 + $0x100] sm:$0xff] }
 0x424   :  { %920 = vmatpush.msra.mxu0 %v765_v21 }
 0x472   :  { %v646_v3 = vpop.f32.mrf.mxu1 }
 0x473   :  { %v647_v9 = vadd.f32 %v1612_v6, %v646_v3  ;;  %v836_v6 = vld [vmem:[#allocation10 + $0x338] sm:$0xff] }
 0x478   :  { %v687_v17 = vpop.f32.mrf.mxu3 }
 0x479   :  { %v690_v22 = vadd.f32 %v687_v17, %v175_v10 }
 0x47b   :  { %1083 = vtanh.f32 %v690_v22 }
 0x480   :  { %v902_v59 = vpop.f32.mrf.mxu3 }
 0x481   :  { %v1084_v2 = vpop.eup %1083 }
 0x482   :  { %708 = vmatmul.f32.vlgmr.msrb.gmra.mxu0 %v1084_v2 }
 0x483   :  { %985 = vmatpush.msrb.mxu0 %v844_v26 }
 0x485   :  { %986 = vmatpush.msrb.mxu0 %v843_v5 }
 0x486   :  { %v666_v11 = vpop.f32.mrf.mxu2 }
 0x487   :  { %v667_v13 = vadd.f32 %v666_v11, %v647_v9  ;;  %987 = vmatpush.msrb.mxu0 %v842_v7 }
 0x489   :  { %1085 = vtanh.f32 %v667_v13  ;;  %988 = vmatpush.msrb.mxu0 %v841_v34 }
 0x48a   :  { %921 = vmatmul.f32.vlgmr.msra.gmra.mxu0 %v1744_v38  ;;  %v833_v38 = vld [vmem:[#allocation10 + $0x320] sm:$0xff] }
 0x48b   :  { %989 = vmatpush.msrb.mxu0 %v840_v14 }
 0x48d   :  { %990 = vmatpush.msrb.mxu0 %v839_v15 }
 0x48e   :  { %v882_v58 = vpop.f32.mrf.mxu2 }
 0x48f   :  { %v1086_v20 = vpop.eup %1085  ;;  %991 = vmatpush.msrb.mxu0 %v838_v16  ;;  %v883_v21 = vadd.f32 %v1056_v57, %v882_v58 }
 0x490   :  { %728 = vmatmul.f32.vlgmr.msra.gmra.mxu1 %v1086_v20 }
 0x491   :  { %992 = vmatpush.msrb.mxu0 %v837_v18  ;;  %1005 = vmatpush.msra.mxu1 %v860_v19  ;;  %v903_v61 = vadd.f32 %v902_v59, %v883_v21 }
 0x493   :  { %993 = vmatpush.msrb.mxu0 %v836_v6  ;;  %1006 = vmatpush.msra.mxu1 %v859_v23 }
 0x495   :  { %994 = vmatpush.msrb.mxu0 %v835_v24  ;;  %1007 = vmatpush.msra.mxu1 %v858_v25 }
 0x497   :  { %995 = vmatpush.msrb.mxu0 %v834_v27  ;;  %1008 = vmatpush.msra.mxu1 %v857_v28 }
 0x498   :  { %941 = vmatmul.f32.vlgmr.msrb.gmra.mxu1 %v1792_v42  ;;  %v851_v42 = vld [vmem:[#allocation10 + $0x3b0] sm:$0xff]  ;;  %v982_v51 = vpop.f32.mrf.mxu3 }
 0x499   :  { %996 = vmatpush.msrb.mxu0 %v833_v38  ;;  %1009 = vmatpush.msra.mxu1 %v856_v30 }
 0x49b   :  { %997 = vmatpush.msrb.mxu0 %v832_v29  ;;  %1010 = vmatpush.msra.mxu1 %v855_v35 }
 0x49d   :  { %998 = vmatpush.msrb.mxu0 %v831_v31  ;;  %1011 = vmatpush.msra.mxu1 %v854_v36 }
 0x49f   :  { %999 = vmatpush.msrb.mxu0 %v830_v32  ;;  %1012 = vmatpush.msra.mxu1 %v853_v37 }
 0x4a1   :  { %1000 = vmatpush.msrb.mxu0 %v829_v33  ;;  %1013 = vmatpush.msra.mxu1 %v852_v39 }
 0x4a2   :  { %1001 = vmatmul.f32.vlgmr.msrb.gmra.mxu0 %v1086_v20 }
 0x4a3   :  { %1014 = vmatpush.msra.mxu1 %v851_v42 }
 0x4a5   :  { %1015 = vmatpush.msra.mxu1 %v850_v40 }
 0x4a6   :  { %v962_v4 = vpop.f32.mrf.mxu2 }
 0x4a7   :  { %1016 = vmatpush.msra.mxu1 %v849_v41 }
 0x4a9   :  { %1017 = vmatpush.msra.mxu1 %v848_v43 }
 0x4ab   :  { %1018 = vmatpush.msra.mxu1 %v847_v44 }
 0x4ad   :  { %1019 = vmatpush.msra.mxu1 %v846_v45 }
 0x4af   :  { %1020 = vmatpush.msra.mxu1 %v845_v47 }
 0x4ff   :  { %v709_v48 = vpop.f32.mrf.mxu0 }
 0x500   :  { %v710_v53 = vadd.f32 %v1090_v50, %v709_v48 }
 0x507   :  { %v922_v60 = vpop.f32.mrf.mxu0 }
 0x508   :  { %v923_v0 = vadd.f32 %v922_v60, %v903_v61 }
 0x50d   :  { %v729_v54 = vpop.f32.mrf.mxu1 }
 0x50e   :  { %v730_v55 = vadd.f32 %v729_v54, %v710_v53 }
 0x510   :  { %1087 = vtanh.f32 %v730_v55 }
 0x515   :  { %v942_v62 = vpop.f32.mrf.mxu1 }
 0x516   :  { %v1088_v56 = vpop.eup %1087  ;;  %v943_v1 = vadd.f32 %v942_v62, %v923_v0 }
 0x517   :  { %1021 = vmatmul.f32.vlgmr.msra.gmra.mxu1 %v1088_v56 }
 0x518   :  { %v963_v46 = vadd.f32 %v962_v4, %v943_v1 }
 0x51a   :  { %v983_v63 = vadd.f32 %v982_v51, %v963_v46 }
 0x51f   :  { %v1002_v52 = vpop.f32.mrf.mxu0 }
 0x520   :  { %v1003_v8 = vadd.f32 %v1002_v52, %v983_v63 }
 0x594   :  { %v1022_v12 = vpop.f32.mrf.mxu1 }
 0x595   :  { %v1023_v10 = vadd.f32 %v1022_v12, %v1003_v8 }
 0x597   :  { %1025 = vst [vmem:[#allocation11] sm:$0xff] %v1023_v10 }
 0x598   :  { %1036 = dma.vmem_to_hbm [thread:$0]  %s1032_s14, 128, %s1034_s17, [#allocation4]  }
 0x599   :  { %1241 = dma.done.wait [#allocation4], 128  }
 0x59a   :  { %1242 = vsyncadd [#allocation4], 4294967168 }
 0x59b   :  { %1041 = vsyncpa [#allocation3], 1 }
 0x59c   :  { %1042 = vsyncpa [#allocation6], 1 }
 0x59d   :  { %1043 = vsyncpa [#allocation9], 1 }
 0x59e   :  { %1044 = vsyncpa [#allocation4], 1 }

</bundles_post_ra>
